<compile_context>
chip_gen: v7x
topology: tpu7x:2x2x1
jax: 0.10.0
libtpu: 0.0.40
codegen_flags: <defaults>
</compile_context>

<pallas_src>
import functools

import jax
import jax.numpy as jnp
from jax.experimental import pallas as pl
from jax.experimental.pallas import tpu as pltpu

EPS = 1e-5


def _relu_conv1x1_bn_kernel(m_true, x_ref, w_ref, gb_ref, o_ref, xb_ref):
    # x_ref : (C_in, m_true) f32   activations, channel-major, VMEM-resident
    # w_ref : (tn, C_in)     f32   1x1-conv weight slab (cast to bf16 in-kernel)
    # gb_ref: (tn, 2)        f32   fused [gamma | beta] columns
    # o_ref : (tn, M_pad)    f32   lane-dense output tile (M_pad multiple of 128)
    # xb_ref: (C_in, M_pad)  bf16  scratch: ReLU'd, bf16, zero-padded activations

    # Stage ReLU + bf16 cast + zero-pad of the resident activations.
    xb_ref[...] = jnp.zeros_like(xb_ref)
    xb_ref[:, :m_true] = jnp.maximum(x_ref[...], 0.0).astype(jnp.bfloat16)

    # 1x1 conv == MXU matmul with f32 accumulation.
    w = w_ref[...].astype(jnp.bfloat16)
    y = jnp.dot(w, xb_ref[...], preferred_element_type=jnp.float32)   # (tn, M_pad)

    # BatchNorm training statistics over the pixel axis.  Padded columns of y
    # are exactly zero, so sums are unaffected; divide by the true pixel count.
    inv_m = 1.0 / m_true
    s1 = jnp.sum(y, axis=1, keepdims=True)             # (tn, 1)  XLU lane reduce
    s2 = jnp.sum(y * y, axis=1, keepdims=True)         # (tn, 1)
    mean = s1 * inv_m
    var = jnp.maximum(s2 * inv_m - mean * mean, 0.0)    # biased (training) variance
    inv_std = jax.lax.rsqrt(var + EPS)                  # EUP

    gamma = gb_ref[:, 0:1]
    beta = gb_ref[:, 1:2]
    scale = inv_std * gamma                             # (tn, 1)
    shift = beta - mean * scale                         # (tn, 1)
    o_ref[...] = y * scale + shift                      # unmasked, lane-dense store


def _pick_num_tiles(c_out):
    """Grid size over C_out tiles: 2 on v7x (two TensorCores per chip, split via
    the 'parallel' axis); 1 on single-TC v5e/v6e to minimize per-step overhead."""
    try:
        kind = jax.devices()[0].device_kind.lower()
    except Exception:
        kind = ""
    n = 2 if "v7" in kind else 1
    if c_out % n == 0 and (c_out // n) % 8 == 0:
        return n
    return 1


def relu_conv1x1_bn(x_nchw, w_oi, gamma, beta, *, num_tiles=None):
    """x_nchw: (N, C_in, H, W); w_oi: (C_out, C_in); gamma/beta: (C_out,)."""
    N, C_in, H, W = x_nchw.shape
    C_out = w_oi.shape[0]
    M = N * H * W
    M_pad = ((M + 127) // 128) * 128          # lane-dense output width

    if num_tiles is None:
        num_tiles = _pick_num_tiles(C_out)
    tn = C_out // num_tiles

    # Channel-major (C_in, M) activation matrix.  Free reshape for N == 1.
    if N == 1:
        x_mat = x_nchw.reshape(C_in, M)
    else:
        x_mat = jnp.transpose(x_nchw, (1, 0, 2, 3)).reshape(C_in, M)
    x_mat = x_mat.astype(jnp.float32)

    # No per-call wrapper cast of the weight (would be an extra un-fused HBM
    # read+write); the kernel casts each slab to bf16 in registers.
    w_mat = w_oi.reshape(C_out, C_in)

    # Single fused (C_out, 2) [gamma | beta] array -> one tiny DMA per step.
    gb = jnp.stack([gamma.astype(jnp.float32), beta.astype(jnp.float32)], axis=1)

    # VMEM budget: x resident (single buffer, constant index_map), bf16 scratch,
    # double-buffered weight / output / gamma-beta tiles, +2 MiB margin.
    lane = 128
    need = (C_in * M_pad * 4            # resident f32 activations (lane-padded)
            + C_in * M_pad * 2          # bf16 activation scratch
            + 2 * tn * C_in * 4         # double-buffered weight slabs
            + 2 * tn * M_pad * 4        # double-buffered output tiles
            + 2 * tn * lane * 4         # gamma/beta tile (lane-padded layout)
            + (2 << 20))
    vmem_limit = int(min(max(need, 4 << 20), 100 << 20))

    cost = pl.CostEstimate(
        flops=2 * M_pad * C_in * C_out + 8 * C_out * M_pad,
        transcendentals=C_out,                          # one rsqrt per channel
        bytes_accessed=(4 * C_in * M
                        + int(w_mat.dtype.itemsize) * C_in * C_out
                        + 4 * C_out * M_pad
                        + 8 * C_out),
    )

    out_mat = pl.pallas_call(
        functools.partial(_relu_conv1x1_bn_kernel, M),
        out_shape=jax.ShapeDtypeStruct((C_out, M_pad), jnp.float32),
        grid_spec=pltpu.PrefetchScalarGridSpec(
            num_scalar_prefetch=0,
            grid=(num_tiles,),
            in_specs=[
                pl.BlockSpec((C_in, M), lambda j: (0, 0)),    # resident activations
                pl.BlockSpec((tn, C_in), lambda j: (j, 0)),   # streamed weight slab
                pl.BlockSpec((tn, 2), lambda j: (j, 0)),      # fused gamma/beta
            ],
            out_specs=pl.BlockSpec((tn, M_pad), lambda j: (j, 0)),
            scratch_shapes=[pltpu.VMEM((C_in, M_pad), jnp.bfloat16)],
        ),
        compiler_params=pltpu.CompilerParams(
            dimension_semantics=("parallel",),   # C_out tiles independent -> megacore on v7x
            vmem_limit_bytes=vmem_limit,
        ),
        cost_estimate=cost,
    )(x_mat, w_mat, gb)

    out_mat = out_mat[:, :M]                     # drop lane padding
    if N == 1:
        return out_mat.reshape(1, C_out, H, W)
    return out_mat.reshape(C_out, N, H, W).transpose(1, 0, 2, 3)


def _reference(x_nchw, w_oi, gamma, beta):
    x = jnp.maximum(x_nchw, 0.0)
    y = jnp.einsum("nchw,oc->nohw", x, w_oi)
    mean = jnp.mean(y, axis=(0, 2, 3), keepdims=True)
    var = jnp.mean((y - mean) ** 2, axis=(0, 2, 3), keepdims=True)
    ynorm = (y - mean) / jnp.sqrt(var + EPS)
    return ynorm * gamma.reshape(1, -1, 1, 1) + beta.reshape(1, -1, 1, 1)


if __name__ == "__main__":
    # Module config scaled down in channels (original: N=1, C=1024, H=W=14).
    N, C, H, W = 1, 256, 14, 14
    key = jax.random.PRNGKey(0)
    kx, kw, kg, kb = jax.random.split(key, 4)

    x = jax.random.normal(kx, (N, C, H, W), dtype=jnp.float32)
    # Conv2d(C, C, 1x1, bias=False) weight: (C_out, C_in, 1, 1) squeezed to (C_out, C_in)
    w = jax.random.normal(kw, (C, C), dtype=jnp.float32) * (1.0 / jnp.sqrt(C))
    gamma = 1.0 + 0.1 * jax.random.normal(kg, (C,), dtype=jnp.float32)
    beta = 0.1 * jax.random.normal(kb, (C,), dtype=jnp.float32)

    out = relu_conv1x1_bn(x, w, gamma, beta)
    out = jax.block_until_ready(out)

    ref = _reference(x, w, gamma, beta)
    assert out.shape == (N, C, H, W)
    # bf16 matmul inputs (f32 accumulation / f32 BN stats) -> relaxed tolerance.
    max_err = float(jnp.max(jnp.abs(out - ref)))
    assert jnp.allclose(out, ref, atol=2e-2, rtol=2e-2), f"max_abs_err={max_err}"

    print("KERNEL_OK")
</pallas_src>

<mosaic_0001>
module attributes {stable_mosaic.version = 11 : i64} {
  func.func @_relu_conv1x1_bn_kernel(%arg0: i32, %arg1: memref<256x196xf32, #tpu.memory_space<vmem>>, %arg2: memref<256x256xf32, #tpu.memory_space<vmem>>, %arg3: memref<256x2xf32, #tpu.memory_space<vmem>>, %arg4: memref<256x256xf32, #tpu.memory_space<vmem>>, %arg5: memref<256x256xbf16, #tpu.memory_space<vmem>>) attributes {dimension_semantics = [#tpu.dimension_semantics<parallel>], iteration_bounds = array<i64: 1>, scalar_prefetch = 0 : i64, scratch_operands = 1 : i64, tpu.core_type = #tpu.core_type<tc>, window_params = [{pipeline_mode = #tpu.pipeline_mode<synchronous>, transform_indices = @transform_0, window_bounds = array<i64: 256, 196>}, {transform_indices = @transform_1, window_bounds = array<i64: 256, 256>}, {transform_indices = @transform_2, window_bounds = array<i64: 256, 2>}, {transform_indices = @transform_3, window_bounds = array<i64: 256, 256>}]} {
    %cst = arith.constant 0.000000e+00 : bf16
    %0 = vector.broadcast %cst : bf16 to vector<256x256xbf16>
    %c0 = arith.constant 0 : index
    %c0_0 = arith.constant 0 : index
    %1 = vector.load %arg5[%c0, %c0_0] : memref<256x256xbf16, #tpu.memory_space<vmem>>, vector<256x256xbf16>
    tpu.vector_store %arg5[%c0, %c0_0], %0 {strides = array<i32>} : memref<256x256xbf16, #tpu.memory_space<vmem>>, vector<256x256xbf16>,
    %c0_1 = arith.constant 0 : index
    %c0_2 = arith.constant 0 : index
    %2 = vector.load %arg1[%c0_1, %c0_2] : memref<256x196xf32, #tpu.memory_space<vmem>>, vector<256x196xf32>
    %cst_3 = arith.constant 0.000000e+00 : f32
    %3 = vector.broadcast %cst_3 : f32 to vector<256x196xf32>
    %4 = arith.maximumf %2, %3 : vector<256x196xf32>
    %5 = arith.truncf %4 : vector<256x196xf32> to vector<256x196xbf16>
    %c0_4 = arith.constant 0 : index
    %c0_5 = arith.constant 0 : index
    %6 = vector.load %arg5[%c0_4, %c0_5] : memref<256x256xbf16, #tpu.memory_space<vmem>>, vector<256x196xbf16>
    tpu.vector_store %arg5[%c0_4, %c0_5], %5 {strides = array<i32>} : memref<256x256xbf16, #tpu.memory_space<vmem>>, vector<256x196xbf16>,
    %c0_6 = arith.constant 0 : index
    %c0_7 = arith.constant 0 : index
    %7 = vector.load %arg2[%c0_6, %c0_7] : memref<256x256xf32, #tpu.memory_space<vmem>>, vector<256x256xf32>
    %8 = arith.truncf %7 : vector<256x256xf32> to vector<256x256xbf16>
    %c0_8 = arith.constant 0 : index
    %c0_9 = arith.constant 0 : index
    %9 = vector.load %arg5[%c0_8, %c0_9] : memref<256x256xbf16, #tpu.memory_space<vmem>>, vector<256x256xbf16>
    %cst_10 = arith.constant dense<0.000000e+00> : vector<256x256xf32>
    %10 = tpu.matmul %8, %9, %cst_10 {dimension_numbers = #tpu.dot_dimension_numbers<[1], [0], [0], [1], [0, 0, 1, 1], [], []>} : vector<256x256xbf16>, vector<256x256xbf16>, vector<256x256xf32> -> vector<256x256xf32>
    %cst_11 = arith.constant dense<0.000000e+00> : vector<256xf32>
    %11 = vector.multi_reduction <add>, %10, %cst_11 [1] : vector<256x256xf32> to vector<256xf32>
    %12 = vector.shape_cast %11 : vector<256xf32> to vector<256x1xf32>
    %13 = arith.mulf %10, %10 : vector<256x256xf32>
    %cst_12 = arith.constant dense<0.000000e+00> : vector<256xf32>
    %14 = vector.multi_reduction <add>, %13, %cst_12 [1] : vector<256x256xf32> to vector<256xf32>
    %15 = vector.shape_cast %14 : vector<256xf32> to vector<256x1xf32>
    %cst_13 = arith.constant 0.00510204071 : f32
    %16 = vector.broadcast %cst_13 : f32 to vector<256x1xf32>
    %17 = arith.mulf %12, %16 : vector<256x1xf32>
    %cst_14 = arith.constant 0.00510204071 : f32
    %18 = vector.broadcast %cst_14 : f32 to vector<256x1xf32>
    %19 = arith.mulf %15, %18 : vector<256x1xf32>
    %20 = arith.mulf %17, %17 : vector<256x1xf32>
    %21 = arith.subf %19, %20 : vector<256x1xf32>
    %cst_15 = arith.constant 0.000000e+00 : f32
    %22 = vector.broadcast %cst_15 : f32 to vector<256x1xf32>
    %23 = arith.maximumf %21, %22 : vector<256x1xf32>
    %cst_16 = arith.constant 9.99999974E-6 : f32
    %24 = vector.broadcast %cst_16 : f32 to vector<256x1xf32>
    %25 = arith.addf %23, %24 : vector<256x1xf32>
    %26 = math.rsqrt %25 : vector<256x1xf32>
    %c0_17 = arith.constant 0 : index
    %c0_18 = arith.constant 0 : index
    %27 = vector.load %arg3[%c0_17, %c0_18] : memref<256x2xf32, #tpu.memory_space<vmem>>, vector<256x1xf32>
    %c0_19 = arith.constant 0 : index
    %c1 = arith.constant 1 : index
    %28 = vector.load %arg3[%c0_19, %c1] : memref<256x2xf32, #tpu.memory_space<vmem>>, vector<256x1xf32>
    %29 = arith.mulf %26, %27 : vector<256x1xf32>
    %30 = arith.mulf %17, %29 : vector<256x1xf32>
    %31 = arith.subf %28, %30 : vector<256x1xf32>
    %32 = vector.broadcast %29 : vector<256x1xf32> to vector<256x256xf32>
    %33 = arith.mulf %10, %32 : vector<256x256xf32>
    %34 = vector.broadcast %31 : vector<256x1xf32> to vector<256x256xf32>
    %35 = arith.addf %33, %34 : vector<256x256xf32>
    %c0_20 = arith.constant 0 : index
    %c0_21 = arith.constant 0 : index
    %36 = vector.load %arg4[%c0_20, %c0_21] : memref<256x256xf32, #tpu.memory_space<vmem>>, vector<256x256xf32>
    tpu.vector_store %arg4[%c0_20, %c0_21], %35 {strides = array<i32>} : memref<256x256xf32, #tpu.memory_space<vmem>>, vector<256x256xf32>,
    return
  }
  func.func @transform_0(%arg0: i32) -> (i32, i32) {
    %c0_i32 = arith.constant 0 : i32
    %c0_i32_0 = arith.constant 0 : i32
    %c0_i32_1 = arith.constant 0 : i32
    return %c0_i32, %c0_i32_0 : i32, i32
  }
  func.func @transform_1(%arg0: i32) -> (i32, i32) {
    %c0_i32 = arith.constant 0 : i32
    %c0_i32_0 = arith.constant 0 : i32
    return %arg0, %c0_i32 : i32, i32
  }
  func.func @transform_2(%arg0: i32) -> (i32, i32) {
    %c0_i32 = arith.constant 0 : i32
    %c0_i32_0 = arith.constant 0 : i32
    return %arg0, %c0_i32 : i32, i32
  }
  func.func @transform_3(%arg0: i32) -> (i32, i32) {
    %c0_i32 = arith.constant 0 : i32
    %c0_i32_0 = arith.constant 0 : i32
    return %arg0, %c0_i32 : i32, i32
  }
}

</mosaic_0001>

<bundles_post_ra>
// kernel: tpu_custom_call.1
= control target key start
LH: loop header
LB: loop body
LE: loop exit
PB: predicated region body
PF: predicated region fallthrough
CT: control target
= control target key end

     0   :  { %vm209_vm0 = vcmask 556032   ;;  %v1956_v3 = vmov 0   ;;  %s3550_s0 = inlined_call_operand.vmem [shape: f32[256,196], index: 0, kind: input, shape index: {}]   ;;  %s3551_s1 = inlined_call_operand.vmem [shape: f32[256,256], index: 1, kind: input, shape index: {}]   ;;  %s3552_s2 = inlined_call_operand.vmem [shape: f32[256,2], index: 2, kind: input, shape index: {}]   ;;  %s3553_s3 = inlined_call_operand.hbm [shape: f32[256,256], index: 3, kind: output, shape index: {}]  }
   0x1   :  { %v49_v0 = vld [vmem:[%s3550_s0 + $0x8] sm:$0xff]  ;;  %v51_v1 = vld [vmem:[%s3550_s0 + $0x18] sm:$0xff]  ;;  %v48_v2 = vld [vmem:[%s3550_s0] sm:$0xff]  ;;  %17 = vst [vmem:[#allocation2 + $0x8] sm:$0xff] %v1956_v3  ;;  %1864 = vset.pattern.permute.xlu0 %v1956_v3  ;;  %1865 = vset.pattern.permute.xlu1 %v1956_v3 }
   0x2   :  { %v113_v4 = vmax.f32 %v49_v0, 0.0  ;;  %v115_v5 = vmax.f32 %v51_v1, 0.0  ;;  %19 = vst [vmem:[#allocation2 + $0x18] sm:$0xff] %v1956_v3  ;;  %21 = vst [vmem:[#allocation2 + $0x28] sm:$0xff] %v1956_v3  ;;  %v50_v6 = vld [vmem:[%s3550_s0 + $0x10] sm:$0xff]  ;;  %v112_v7 = vmax.f32 %v48_v2, 0.0 }
   0x3   :  { %23 = vst [vmem:[#allocation2 + $0x38] sm:$0xff] %v1956_v3  ;;  %25 = vst [vmem:[#allocation2 + $0x48] sm:$0xff] %v1956_v3  ;;  %v53_v8 = vld [vmem:[%s3550_s0 + $0x28] sm:$0xff]  ;;  %v55_v9 = vld [vmem:[%s3550_s0 + $0x38] sm:$0xff]  ;;  %v114_v10 = vmax.f32 %v50_v6, 0.0 }
   0x4   :  { %27 = vst [vmem:[#allocation2 + $0x58] sm:$0xff] %v1956_v3  ;;  %29 = vst [vmem:[#allocation2 + $0x68] sm:$0xff] %v1956_v3  ;;  %v117_v11 = vmax.f32 %v53_v8, 0.0  ;;  %v119_v12 = vmax.f32 %v55_v9, 0.0  ;;  %v52_v13 = vld [vmem:[%s3550_s0 + $0x20] sm:$0xff]  ;;  %v54_v14 = vld [vmem:[%s3550_s0 + $0x30] sm:$0xff]  ;;  %v177_v16 = vpack.c.bf16 %v115_v5, %v113_v4 }
   0x5   :  { %31 = vst [vmem:[#allocation2 + $0x78] sm:$0xff] %v1956_v3  ;;  %33 = vst [vmem:[#allocation2 + $0x88] sm:$0xff] %v1956_v3  ;;  %v57_v15 = vld [vmem:[%s3550_s0 + $0x48] sm:$0xff]  ;;  %v116_v17 = vmax.f32 %v52_v13, 0.0  ;;  %v118_v18 = vmax.f32 %v54_v14, 0.0  ;;  %v59_v19 = vld [vmem:[%s3550_s0 + $0x58] sm:$0xff]  ;;  %v2018_v23 = vpack.c.bf16 %v114_v10, %v112_v7 }
   0x6   :  { %35 = vst [vmem:[#allocation2 + $0x98] sm:$0xff] %v1956_v3  ;;  %37 = vst [vmem:[#allocation2 + $0xa8] sm:$0xff] %v1956_v3  ;;  %v121_v20 = vmax.f32 %v57_v15, 0.0  ;;  %v56_v21 = vld [vmem:[%s3550_s0 + $0x40] sm:$0xff]  ;;  %v58_v22 = vld [vmem:[%s3550_s0 + $0x50] sm:$0xff]  ;;  %v179_v24 = vpack.c.bf16 %v119_v12, %v117_v11  ;;  %v123_v25 = vmax.f32 %v59_v19, 0.0 }
   0x7   :  { %39 = vst [vmem:[#allocation2 + $0xb8] sm:$0xff] %v1956_v3  ;;  %41 = vst [vmem:[#allocation2 + $0xc8] sm:$0xff] %v1956_v3  ;;  %v120_v26 = vmax.f32 %v56_v21, 0.0  ;;  %v61_v27 = vld [vmem:[%s3550_s0 + $0x68] sm:$0xff]  ;;  %v63_v28 = vld [vmem:[%s3550_s0 + $0x78] sm:$0xff]  ;;  %v2030_v30 = vpack.c.bf16 %v118_v18, %v116_v17  ;;  %v122_v31 = vmax.f32 %v58_v22, 0.0 }
   0x8   :  { %43 = vst [vmem:[#allocation2 + $0xd8] sm:$0xff] %v1956_v3  ;;  %45 = vst [vmem:[#allocation2 + $0xe8] sm:$0xff] %v1956_v3  ;;  %v60_v29 = vld [vmem:[%s3550_s0 + $0x60] sm:$0xff]  ;;  %v125_v32 = vmax.f32 %v61_v27, 0.0  ;;  %v127_v33 = vmax.f32 %v63_v28, 0.0  ;;  %v62_v34 = vld [vmem:[%s3550_s0 + $0x70] sm:$0xff]  ;;  %v181_v37 = vpack.c.bf16 %v123_v25, %v121_v20 }
   0x9   :  { %47 = vst [vmem:[#allocation2 + $0xf8] sm:$0xff] %v1956_v3  ;;  %210 = vst.msk [vmem:[#allocation2 + $0x8] sm:$0xff] %vm209_vm0, %v177_v16  ;;  %v65_v35 = vld [vmem:[%s3550_s0 + $0x88] sm:$0xff]  ;;  %v67_v36 = vld [vmem:[%s3550_s0 + $0x98] sm:$0xff]  ;;  %v124_v38 = vmax.f32 %v60_v29, 0.0  ;;  %v126_v39 = vmax.f32 %v62_v34, 0.0  ;;  %v2051_v44 = vpack.c.bf16 %v122_v31, %v120_v26 }
   0xa   :  { %212 = vst.msk [vmem:[#allocation2 + $0x18] sm:$0xff] %vm209_vm0, %v179_v24  ;;  %v129_v40 = vmax.f32 %v65_v35, 0.0  ;;  %v64_v41 = vld [vmem:[%s3550_s0 + $0x80] sm:$0xff]  ;;  %v66_v42 = vld [vmem:[%s3550_s0 + $0x90] sm:$0xff]  ;;  %v69_v43 = vld [vmem:[%s3550_s0 + $0xa8] sm:$0xff]  ;;  %v183_v45 = vpack.c.bf16 %v127_v33, %v125_v32  ;;  %v131_v46 = vmax.f32 %v67_v36, 0.0 }
   0xb   :  { %v128_v47 = vmax.f32 %v64_v41, 0.0  ;;  %v71_v48 = vld [vmem:[%s3550_s0 + $0xb8] sm:$0xff]  ;;  %v68_v49 = vld [vmem:[%s3550_s0 + $0xa0] sm:$0xff]  ;;  %v70_v50 = vld [vmem:[%s3550_s0 + $0xb0] sm:$0xff]  ;;  %214 = vst.msk [vmem:[#allocation2 + $0x28] sm:$0xff] %vm209_vm0, %v181_v37  ;;  %v2063_v51 = vpack.c.bf16 %v126_v39, %v124_v38  ;;  %v130_v52 = vmax.f32 %v66_v42, 0.0 }
   0xc   :  { %v133_v53 = vmax.f32 %v69_v43, 0.0  ;;  %v135_v54 = vmax.f32 %v71_v48, 0.0  ;;  %v73_v55 = vld [vmem:[%s3550_s0 + $0xc8] sm:$0xff]  ;;  %v75_v56 = vld [vmem:[%s3550_s0 + $0xd8] sm:$0xff]  ;;  %v72_v57 = vld [vmem:[%s3550_s0 + $0xc0] sm:$0xff]  ;;  %216 = vst.msk [vmem:[#allocation2 + $0x38] sm:$0xff] %vm209_vm0, %v183_v45  ;;  %v185_v58 = vpack.c.bf16 %v131_v46, %v129_v40 }
   0xd   :  { %v132_v59 = vmax.f32 %v68_v49, 0.0  ;;  %v134_v60 = vmax.f32 %v70_v50, 0.0  ;;  %v137_v61 = vmax.f32 %v73_v55, 0.0  ;;  %v74_v62 = vld [vmem:[%s3550_s0 + $0xd0] sm:$0xff]  ;;  %v77_v63 = vld [vmem:[%s3550_s0 + $0xe8] sm:$0xff]  ;;  %v79_v0 = vld [vmem:[%s3550_s0 + $0xf8] sm:$0xff]  ;;  %v2084_v1 = vpack.c.bf16 %v130_v52, %v128_v47 }
   0xe   :  { %v187_v2 = vpack.c.bf16 %v135_v54, %v133_v53  ;;  %v139_v3 = vmax.f32 %v75_v56, 0.0  ;;  %v136_v4 = vmax.f32 %v72_v57, 0.0  ;;  %v76_v5 = vld [vmem:[%s3550_s0 + $0xe0] sm:$0xff]  ;;  %v78_v6 = vld [vmem:[%s3550_s0 + $0xf0] sm:$0xff]  ;;  %v81_v7 = vld [vmem:[%s3550_s0 + $0x108] sm:$0xff]  ;;  %218 = vst.msk [vmem:[#allocation2 + $0x48] sm:$0xff] %vm209_vm0, %v185_v58 }
   0xf   :  { %v2096_v8 = vpack.c.bf16 %v134_v60, %v132_v59  ;;  %v138_v9 = vmax.f32 %v74_v62, 0.0  ;;  %v141_v10 = vmax.f32 %v77_v63, 0.0  ;;  %v143_v11 = vmax.f32 %v79_v0, 0.0  ;;  %v83_v12 = vld [vmem:[%s3550_s0 + $0x118] sm:$0xff]  ;;  %v80_v13 = vld [vmem:[%s3550_s0 + $0x100] sm:$0xff]  ;;  %v82_v14 = vld [vmem:[%s3550_s0 + $0x110] sm:$0xff] }
  0x10   :  { %v338_v15 = vld [vmem:[#allocation2 + $0x8] sm:$0xff]  ;;  %220 = vst.msk [vmem:[#allocation2 + $0x58] sm:$0xff] %vm209_vm0, %v187_v2  ;;  %v189_v16 = vpack.c.bf16 %v139_v3, %v137_v61  ;;  %v140_v17 = vmax.f32 %v76_v5, 0.0  ;;  %v142_v18 = vmax.f32 %v78_v6, 0.0  ;;  %v145_v19 = vmax.f32 %v81_v7, 0.0  ;;  %v87_v21 = vld [vmem:[%s3550_s0 + $0x138] sm:$0xff] }
  0x11   :  { %v85_v20 = vld [vmem:[%s3550_s0 + $0x128] sm:$0xff]  ;;  %369 = vmatprep.subr.bf16.mxu0 %v338_v15  ;;  %1826 = vmatprep.subr.bf16.mxu1 %v338_v15  ;;  %v340_v22 = vld [vmem:[#allocation2 + $0x18] sm:$0xff]  ;;  %v2114_v24 = vpack.c.bf16 %v138_v9, %v136_v4  ;;  %v191_v25 = vpack.c.bf16 %v143_v11, %v141_v10  ;;  %v147_v26 = vmax.f32 %v83_v12, 0.0  ;;  %v144_v27 = vmax.f32 %v80_v13, 0.0  ;;  %v84_v28 = vld [vmem:[%s3550_s0 + $0x120] sm:$0xff] }
  0x12   :  { %v86_v29 = vld [vmem:[%s3550_s0 + $0x130] sm:$0xff]  ;;  %370 = vmatpush1.bf16.msra.mxu0 %v2018_v23  ;;  %1842 = vmatpush1.bf16.msra.mxu1 %v2018_v23  ;;  %222 = vst.msk [vmem:[#allocation2 + $0x68] sm:$0xff] %vm209_vm0, %v189_v16  ;;  %v2125_v31 = vpack.c.bf16 %v142_v18, %v140_v17  ;;  %v146_v32 = vmax.f32 %v82_v14, 0.0  ;;  %v149_v33 = vmax.f32 %v85_v20, 0.0  ;;  %v151_v34 = vmax.f32 %v87_v21, 0.0  ;;  %v89_v35 = vld [vmem:[%s3550_s0 + $0x148] sm:$0xff] }
  0x13   :  { %v91_v36 = vld [vmem:[%s3550_s0 + $0x158] sm:$0xff]  ;;  %v88_v37 = vld [vmem:[%s3550_s0 + $0x140] sm:$0xff]  ;;  %371 = vmatprep.subr.bf16.mxu0 %v340_v22  ;;  %1827 = vmatprep.subr.bf16.mxu1 %v340_v22  ;;  %224 = vst.msk [vmem:[#allocation2 + $0x78] sm:$0xff] %vm209_vm0, %v191_v25  ;;  %v193_v23 = vpack.c.bf16 %v147_v26, %v145_v19  ;;  %v148_v38 = vmax.f32 %v84_v28, 0.0  ;;  %v150_v39 = vmax.f32 %v86_v29, 0.0  ;;  %v153_v40 = vmax.f32 %v89_v35, 0.0 }
  0x14   :  { %v90_v41 = vld [vmem:[%s3550_s0 + $0x150] sm:$0xff]  ;;  %v93_v42 = vld [vmem:[%s3550_s0 + $0x168] sm:$0xff]  ;;  %v2143_v45 = vpack.c.bf16 %v146_v32, %v144_v27  ;;  %v195_v46 = vpack.c.bf16 %v151_v34, %v149_v33  ;;  %v155_v47 = vmax.f32 %v91_v36, 0.0  ;;  %v152_v48 = vmax.f32 %v88_v37, 0.0  ;;  %v95_v49 = vld [vmem:[%s3550_s0 + $0x178] sm:$0xff] }
  0x15   :  { %v342_v43 = vld [vmem:[#allocation2 + $0x28] sm:$0xff]  ;;  %v92_v50 = vld [vmem:[%s3550_s0 + $0x160] sm:$0xff]  ;;  %226 = vst.msk [vmem:[#allocation2 + $0x88] sm:$0xff] %vm209_vm0, %v193_v23  ;;  %v2152_v52 = vpack.c.bf16 %v150_v39, %v148_v38  ;;  %v154_v53 = vmax.f32 %v90_v41, 0.0  ;;  %v157_v54 = vmax.f32 %v93_v42, 0.0  ;;  %v159_v55 = vmax.f32 %v95_v49, 0.0 }
  0x16   :  { %v94_v56 = vld [vmem:[%s3550_s0 + $0x170] sm:$0xff]  ;;  %v97_v57 = vld [vmem:[%s3550_s0 + $0x188] sm:$0xff]  ;;  %v99_v58 = vld [vmem:[%s3550_s0 + $0x198] sm:$0xff]  ;;  %372 = vmatpush1.bf16.msra.mxu0 %v2030_v30  ;;  %1843 = vmatpush1.bf16.msra.mxu1 %v2030_v30  ;;  %228 = vst.msk [vmem:[#allocation2 + $0x98] sm:$0xff] %vm209_vm0, %v195_v46  ;;  %v197_v59 = vpack.c.bf16 %v155_v47, %v153_v40  ;;  %v156_v60 = vmax.f32 %v92_v50, 0.0 }
  0x17   :  { %v158_v61 = vmax.f32 %v94_v56, 0.0  ;;  %v161_v62 = vmax.f32 %v97_v57, 0.0  ;;  %v96_v63 = vld [vmem:[%s3550_s0 + $0x180] sm:$0xff]  ;;  %v98_v0 = vld [vmem:[%s3550_s0 + $0x190] sm:$0xff]  ;;  %373 = vmatprep.subr.bf16.mxu0 %v342_v43  ;;  %1828 = vmatprep.subr.bf16.mxu1 %v342_v43  ;;  %v344_v2 = vld [vmem:[#allocation2 + $0x38] sm:$0xff]  ;;  %v2172_v3 = vpack.c.bf16 %v154_v53, %v152_v48  ;;  %v199_v30 = vpack.c.bf16 %v159_v55, %v157_v54 }
  0x18   :  { %v163_v4 = vmax.f32 %v99_v58, 0.0  ;;  %v160_v5 = vmax.f32 %v96_v63, 0.0  ;;  %v101_v6 = vld [vmem:[%s3550_s0 + $0x1a8] sm:$0xff]  ;;  %v103_v7 = vld [vmem:[%s3550_s0 + $0x1b8] sm:$0xff]  ;;  %230 = vst.msk [vmem:[#allocation2 + $0xa8] sm:$0xff] %vm209_vm0, %v197_v59  ;;  %v162_v10 = vmax.f32 %v98_v0, 0.0 }
  0x19   :  { %v2181_v9 = vpack.c.bf16 %v158_v61, %v156_v60  ;;  %v165_v11 = vmax.f32 %v101_v6, 0.0  ;;  %v167_v12 = vmax.f32 %v103_v7, 0.0  ;;  %v100_v13 = vld [vmem:[%s3550_s0 + $0x1a0] sm:$0xff]  ;;  %v102_v14 = vld [vmem:[%s3550_s0 + $0x1b0] sm:$0xff]  ;;  %v105_v15 = vld [vmem:[%s3550_s0 + $0x1c8] sm:$0xff]  ;;  %232 = vst.msk [vmem:[#allocation2 + $0xb8] sm:$0xff] %vm209_vm0, %v199_v30 }
  0x1a   :  { %v201_v16 = vpack.c.bf16 %v163_v4, %v161_v62  ;;  %v164_v17 = vmax.f32 %v100_v13, 0.0  ;;  %v166_v18 = vmax.f32 %v102_v14, 0.0  ;;  %v107_v19 = vld [vmem:[%s3550_s0 + $0x1d8] sm:$0xff]  ;;  %v169_v20 = vmax.f32 %v105_v15, 0.0  ;;  %v104_v21 = vld [vmem:[%s3550_s0 + $0x1c0] sm:$0xff]  ;;  %374 = vmatpush1.bf16.msra.mxu0 %v2051_v44  ;;  %1844 = vmatpush1.bf16.msra.mxu1 %v2051_v44  ;;  %v106_v27 = vld [vmem:[%s3550_s0 + $0x1d0] sm:$0xff] }
  0x1b   :  { %v2201_v22 = vpack.c.bf16 %v162_v10, %v160_v5  ;;  %v203_v25 = vpack.c.bf16 %v167_v12, %v165_v11  ;;  %v171_v26 = vmax.f32 %v107_v19, 0.0  ;;  %v168_v28 = vmax.f32 %v104_v21, 0.0  ;;  %v109_v29 = vld [vmem:[%s3550_s0 + $0x1e8] sm:$0xff]  ;;  %375 = vmatprep.subr.bf16.mxu0 %v344_v2  ;;  %1829 = vmatprep.subr.bf16.mxu1 %v344_v2  ;;  %v111_v33 = vld [vmem:[%s3550_s0 + $0x1f8] sm:$0xff]  ;;  %v108_v35 = vld [vmem:[%s3550_s0 + $0x1e0] sm:$0xff] }
  0x1c   :  { %234 = vst.msk [vmem:[#allocation2 + $0xc8] sm:$0xff] %vm209_vm0, %v201_v16  ;;  %v2210_v32 = vpack.c.bf16 %v166_v18, %v164_v17  ;;  %v170_v44 = vmax.f32 %v106_v27, 0.0  ;;  %v173_v34 = vmax.f32 %v109_v29, 0.0  ;;  %v110_v36 = vld [vmem:[%s3550_s0 + $0x1f0] sm:$0xff]  ;;  %v346_v37 = vld [vmem:[#allocation2 + $0x48] sm:$0xff]  ;;  %v175_v38 = vmax.f32 %v111_v33, 0.0 }
  0x1d   :  { %236 = vst.msk [vmem:[#allocation2 + $0xd8] sm:$0xff] %vm209_vm0, %v203_v25  ;;  %v205_v23 = vpack.c.bf16 %v171_v26, %v169_v20  ;;  %v172_v39 = vmax.f32 %v108_v35, 0.0  ;;  %v174_v40 = vmax.f32 %v110_v36, 0.0  ;;  %v242_v41 = vld [vmem:[%s3551_s1 + $0x8] sm:$0xff]  ;;  %v244_v42 = vld [vmem:[%s3551_s1 + $0x18] sm:$0xff] }
  0x1e   :  { %v2228_v43 = vpack.c.bf16 %v170_v44, %v168_v28  ;;  %v306_v46 = vpack.c.bf16 %v244_v42, %v242_v41  ;;  %v274_v47 = vld [vmem:[%s3551_s1 + $0x108] sm:$0xff]  ;;  %v276_v48 = vld [vmem:[%s3551_s1 + $0x118] sm:$0xff]  ;;  %376 = vmatpush1.bf16.msra.mxu0 %v2063_v51  ;;  %1845 = vmatpush1.bf16.msra.mxu1 %v2063_v51  ;;  %v207_v49 = vpack.c.bf16 %v175_v38, %v173_v34 }
  0x1f   :  { %238 = vst.msk [vmem:[#allocation2 + $0xe8] sm:$0xff] %vm209_vm0, %v205_v23  ;;  %v2239_v50 = vpack.c.bf16 %v174_v40, %v172_v39  ;;  %v322_v53 = vpack.c.bf16 %v276_v48, %v274_v47  ;;  %377 = vmatprep.subr.bf16.mxu0 %v346_v37  ;;  %1830 = vmatprep.subr.bf16.mxu1 %v346_v37  ;;  %v348_v54 = vld [vmem:[#allocation2 + $0x58] sm:$0xff]  ;;  %v350_v51 = vld [vmem:[#allocation2 + $0x68] sm:$0xff] }
  0x20   :  { %240 = vst.msk [vmem:[#allocation2 + $0xf8] sm:$0xff] %vm209_vm0, %v207_v49  ;;  %401 = vmatprep.mubr.bf16.mxu0 %v306_v46  ;;  %v352_v55 = vld [vmem:[#allocation2 + $0x78] sm:$0xff]  ;;  %v354_v56 = vld [vmem:[#allocation2 + $0x88] sm:$0xff] }
  0x21   :  { %481 = vmatprep.mubr.bf16.mxu1 %v322_v53 }
  0x22   :  { %378 = vmatpush1.bf16.msra.mxu0 %v2084_v1  ;;  %1846 = vmatpush1.bf16.msra.mxu1 %v2084_v1  ;;  %v356_v1 = vld [vmem:[#allocation2 + $0x98] sm:$0xff] }
  0x23   :  { %379 = vmatprep.subr.bf16.mxu0 %v348_v54  ;;  %1831 = vmatprep.subr.bf16.mxu1 %v348_v54 }
  0x26   :  { %380 = vmatpush1.bf16.msra.mxu0 %v2096_v8  ;;  %1847 = vmatpush1.bf16.msra.mxu1 %v2096_v8  ;;  %v358_v8 = vld [vmem:[#allocation2 + $0xa8] sm:$0xff] }
  0x27   :  { %381 = vmatprep.subr.bf16.mxu0 %v350_v51  ;;  %1832 = vmatprep.subr.bf16.mxu1 %v350_v51 }
  0x2a   :  { %382 = vmatpush1.bf16.msra.mxu0 %v2114_v24  ;;  %1848 = vmatpush1.bf16.msra.mxu1 %v2114_v24 }
  0x2b   :  { %383 = vmatprep.subr.bf16.mxu0 %v352_v55  ;;  %1833 = vmatprep.subr.bf16.mxu1 %v352_v55 }
  0x2e   :  { %384 = vmatpush1.bf16.msra.mxu0 %v2125_v31  ;;  %1849 = vmatpush1.bf16.msra.mxu1 %v2125_v31 }
  0x2f   :  { %385 = vmatprep.subr.bf16.mxu0 %v354_v56  ;;  %1834 = vmatprep.subr.bf16.mxu1 %v354_v56 }
  0x32   :  { %386 = vmatpush1.bf16.msra.mxu0 %v2143_v45  ;;  %1850 = vmatpush1.bf16.msra.mxu1 %v2143_v45 }
  0x33   :  { %387 = vmatprep.subr.bf16.mxu0 %v356_v1  ;;  %1835 = vmatprep.subr.bf16.mxu1 %v356_v1 }
  0x34   :  { %8 = vsyncpa [#allocation4], 0  ;;  %v360_v24 = vld [vmem:[#allocation2 + $0xb8] sm:$0xff]  ;;  %v362_v31 = vld [vmem:[#allocation2 + $0xc8] sm:$0xff]  ;;  %s1957_s23 = smov 1  }
  0x35   :  { %v364_v45 = vld [vmem:[#allocation2 + $0xd8] sm:$0xff]  ;;  %v241_v58 = vld [vmem:[%s3551_s1] sm:$0xff]  ;;  %v243_v59 = vld [vmem:[%s3551_s1 + $0x10] sm:$0xff] }
  0x36   :  { %388 = vmatpush1.bf16.msra.mxu0 %v2152_v52  ;;  %1851 = vmatpush1.bf16.msra.mxu1 %v2152_v52  ;;  %v366_v52 = vld [vmem:[#allocation2 + $0xe8] sm:$0xff]  ;;  %v368_v57 = vld [vmem:[#allocation2 + $0xf8] sm:$0xff]  ;;  %v273_v60 = vld [vmem:[%s3551_s1 + $0x100] sm:$0xff] }
  0x37   :  { %389 = vmatprep.subr.bf16.mxu0 %v358_v8  ;;  %1836 = vmatprep.subr.bf16.mxu1 %v358_v8  ;;  %v275_v61 = vld [vmem:[%s3551_s1 + $0x110] sm:$0xff]  ;;  %v246_v62 = vld [vmem:[%s3551_s1 + $0x28] sm:$0xff]  ;;  %v248_v63 = vld [vmem:[%s3551_s1 + $0x38] sm:$0xff] }
  0x38   :  { %v278_v0 = vld [vmem:[%s3551_s1 + $0x128] sm:$0xff]  ;;  %v280_v2 = vld [vmem:[%s3551_s1 + $0x138] sm:$0xff]  ;;  %v321_v30 = vpack.c.bf16 %v275_v61, %v273_v60  ;;  %v308_v4 = vpack.c.bf16 %v248_v63, %v246_v62  ;;  %v245_v6 = vld [vmem:[%s3551_s1 + $0x20] sm:$0xff] }
  0x39   :  { %v324_v5 = vpack.c.bf16 %v280_v2, %v278_v0  ;;  %v247_v7 = vld [vmem:[%s3551_s1 + $0x30] sm:$0xff]  ;;  %v250_v11 = vld [vmem:[%s3551_s1 + $0x48] sm:$0xff]  ;;  %v252_v12 = vld [vmem:[%s3551_s1 + $0x58] sm:$0xff] }
  0x3a   :  { %390 = vmatpush1.bf16.msra.mxu0 %v2172_v3  ;;  %1852 = vmatpush1.bf16.msra.mxu1 %v2172_v3  ;;  %v305_v3 = vpack.c.bf16 %v243_v59, %v241_v58  ;;  %v279_v10 = vld [vmem:[%s3551_s1 + $0x130] sm:$0xff]  ;;  %v282_v13 = vld [vmem:[%s3551_s1 + $0x148] sm:$0xff]  ;;  %v284_v14 = vld [vmem:[%s3551_s1 + $0x158] sm:$0xff]  ;;  %v307_v15 = vpack.c.bf16 %v247_v7, %v245_v6  ;;  %v310_v17 = vpack.c.bf16 %v252_v12, %v250_v11 }
  0x3b   :  { %391 = vmatprep.subr.bf16.mxu0 %v360_v24  ;;  %1837 = vmatprep.subr.bf16.mxu1 %v360_v24  ;;  %v326_v18 = vpack.c.bf16 %v284_v14, %v282_v13  ;;  %v249_v19 = vld [vmem:[%s3551_s1 + $0x40] sm:$0xff]  ;;  %v251_v20 = vld [vmem:[%s3551_s1 + $0x50] sm:$0xff]  ;;  %v254_v25 = vld [vmem:[%s3551_s1 + $0x68] sm:$0xff] }
  0x3c   :  { %v281_v21 = vld [vmem:[%s3551_s1 + $0x140] sm:$0xff]  ;;  %v256_v26 = vld [vmem:[%s3551_s1 + $0x78] sm:$0xff]  ;;  %v286_v27 = vld [vmem:[%s3551_s1 + $0x168] sm:$0xff]  ;;  %v309_v29 = vpack.c.bf16 %v251_v20, %v249_v19 }
  0x3d   :  { %v288_v28 = vld [vmem:[%s3551_s1 + $0x178] sm:$0xff]  ;;  %v312_v44 = vpack.c.bf16 %v256_v26, %v254_v25  ;;  %v253_v34 = vld [vmem:[%s3551_s1 + $0x60] sm:$0xff]  ;;  %v255_v35 = vld [vmem:[%s3551_s1 + $0x70] sm:$0xff] }
  0x3e   :  { %392 = vmatpush1.bf16.msra.mxu0 %v2181_v9  ;;  %1853 = vmatpush1.bf16.msra.mxu1 %v2181_v9  ;;  %v277_v9 = vld [vmem:[%s3551_s1 + $0x120] sm:$0xff]  ;;  %v328_v33 = vpack.c.bf16 %v288_v28, %v286_v27  ;;  %v287_v37 = vld [vmem:[%s3551_s1 + $0x170] sm:$0xff]  ;;  %v258_v23 = vld [vmem:[%s3551_s1 + $0x88] sm:$0xff]  ;;  %v311_v41 = vpack.c.bf16 %v255_v35, %v253_v34 }
  0x3f   :  { %393 = vmatprep.subr.bf16.mxu0 %v362_v31  ;;  %1838 = vmatprep.subr.bf16.mxu1 %v362_v31  ;;  %v323_v16 = vpack.c.bf16 %v279_v10, %v277_v9  ;;  %v285_v36 = vld [vmem:[%s3551_s1 + $0x160] sm:$0xff]  ;;  %v260_v38 = vld [vmem:[%s3551_s1 + $0x98] sm:$0xff]  ;;  %v290_v39 = vld [vmem:[%s3551_s1 + $0x188] sm:$0xff] }
  0x40   :  { %v292_v40 = vld [vmem:[%s3551_s1 + $0x198] sm:$0xff]  ;;  %v327_v42 = vpack.c.bf16 %v287_v37, %v285_v36  ;;  %v257_v47 = vld [vmem:[%s3551_s1 + $0x80] sm:$0xff]  ;;  %v259_v48 = vld [vmem:[%s3551_s1 + $0x90] sm:$0xff] }
  0x41   :  { %v330_v46 = vpack.c.bf16 %v292_v40, %v290_v39  ;;  %v289_v49 = vld [vmem:[%s3551_s1 + $0x180] sm:$0xff]  ;;  %v262_v53 = vld [vmem:[%s3551_s1 + $0xa8] sm:$0xff]  ;;  %v264_v54 = vld [vmem:[%s3551_s1 + $0xb8] sm:$0xff]  ;;  %v313_v56 = vpack.c.bf16 %v259_v48, %v257_v47 }
  0x42   :  { %394 = vmatpush1.bf16.msra.mxu0 %v2201_v22  ;;  %1854 = vmatpush1.bf16.msra.mxu1 %v2201_v22  ;;  %v283_v22 = vld [vmem:[%s3551_s1 + $0x150] sm:$0xff]  ;;  %v294_v51 = vld [vmem:[%s3551_s1 + $0x1a8] sm:$0xff]  ;;  %v296_v55 = vld [vmem:[%s3551_s1 + $0x1b8] sm:$0xff]  ;;  %v316_v8 = vpack.c.bf16 %v264_v54, %v262_v53 }
  0x43   :  { %395 = vmatprep.subr.bf16.mxu0 %v364_v45  ;;  %1839 = vmatprep.subr.bf16.mxu1 %v364_v45  ;;  %v332_v24 = vpack.c.bf16 %v296_v55, %v294_v51  ;;  %v261_v31 = vld [vmem:[%s3551_s1 + $0xa0] sm:$0xff]  ;;  %v263_v45 = vld [vmem:[%s3551_s1 + $0xb0] sm:$0xff]  ;;  %v266_v58 = vld [vmem:[%s3551_s1 + $0xc8] sm:$0xff] }
  0x44   :  { %v268_v59 = vld [vmem:[%s3551_s1 + $0xd8] sm:$0xff]  ;;  %v298_v60 = vld [vmem:[%s3551_s1 + $0x1c8] sm:$0xff]  ;;  %v315_v62 = vpack.c.bf16 %v263_v45, %v261_v31 }
  0x45   :  { %v300_v61 = vld [vmem:[%s3551_s1 + $0x1d8] sm:$0xff]  ;;  %v318_v0 = vpack.c.bf16 %v268_v59, %v266_v58  ;;  %v270_v6 = vld [vmem:[%s3551_s1 + $0xe8] sm:$0xff] }
  0x46   :  { %396 = vmatpush1.bf16.msra.mxu0 %v2210_v32  ;;  %1855 = vmatpush1.bf16.msra.mxu1 %v2210_v32  ;;  %v325_v32 = vpack.c.bf16 %v283_v22, %v281_v21  ;;  %v334_v2 = vpack.c.bf16 %v300_v61, %v298_v60  ;;  %v272_v7 = vld [vmem:[%s3551_s1 + $0xf8] sm:$0xff]  ;;  %v302_v9 = vld [vmem:[%s3551_s1 + $0x1e8] sm:$0xff] }
  0x47   :  { %397 = vmatprep.subr.bf16.mxu0 %v366_v52  ;;  %1840 = vmatprep.subr.bf16.mxu1 %v366_v52  ;;  %v293_v52 = vld [vmem:[%s3551_s1 + $0x1a0] sm:$0xff]  ;;  %v304_v10 = vld [vmem:[%s3551_s1 + $0x1f8] sm:$0xff]  ;;  %v320_v13 = vpack.c.bf16 %v272_v7, %v270_v6 }
  0x48   :  { %v336_v14 = vpack.c.bf16 %v304_v10, %v302_v9 }
  0x4a   :  { %398 = vmatpush1.bf16.msra.mxu0 %v2228_v43  ;;  %1856 = vmatpush1.bf16.msra.mxu1 %v2228_v43  ;;  %v314_v43 = vpack.c.bf16 %v260_v38, %v258_v23 }
  0x4b   :  { %399 = vmatprep.subr.bf16.mxu0 %v368_v57  ;;  %1841 = vmatprep.subr.bf16.mxu1 %v368_v57  ;;  %v295_v57 = vld [vmem:[%s3551_s1 + $0x1b0] sm:$0xff] }
  0x4c   :  { %v331_v63 = vpack.c.bf16 %v295_v57, %v293_v52 }
  0x4e   :  { %400 = vmatpush1.bf16.msra.mxu0 %v2239_v50  ;;  %1857 = vmatpush1.bf16.msra.mxu1 %v2239_v50  ;;  %v291_v50 = vld [vmem:[%s3551_s1 + $0x190] sm:$0xff] }
  0x4f   :  { %v329_v1 = vpack.c.bf16 %v291_v50, %v289_v49 }
  0x51   :  { %402 = vmatmul.mubr.bf16.vlgmr.msra.gmra.mrb[0].mxu0 %v305_v3  ;;  %482 = vmatmul.mubr.bf16.vlgmr.msra.gmra.mrb[0].mxu1 %v321_v30  ;;  %v265_v3 = vld [vmem:[%s3551_s1 + $0xc0] sm:$0xff]  ;;  %v267_v30 = vld [vmem:[%s3551_s1 + $0xd0] sm:$0xff] }
  0x52   :  { %411 = vmatprep.mubr.bf16.mxu0 %v308_v4  ;;  %491 = vmatprep.mubr.bf16.mxu1 %v324_v5  ;;  %v297_v4 = vld [vmem:[%s3551_s1 + $0x1c0] sm:$0xff]  ;;  %v299_v5 = vld [vmem:[%s3551_s1 + $0x1d0] sm:$0xff]  ;;  %v317_v11 = vpack.c.bf16 %v267_v30, %v265_v3 }
  0x53   :  { %v333_v12 = vpack.c.bf16 %v299_v5, %v297_v4 }
  0x59   :  { %412 = vmatmul.mubr.bf16.gmra.mrb[4].mxu0 %v307_v15  ;;  %492 = vmatmul.mubr.bf16.gmra.mrb[4].mxu1 %v323_v16  ;;  %v269_v15 = vld [vmem:[%s3551_s1 + $0xe0] sm:$0xff]  ;;  %v271_v16 = vld [vmem:[%s3551_s1 + $0xf0] sm:$0xff] }
  0x5a   :  { %421 = vmatprep.mubr.bf16.mxu0 %v310_v17  ;;  %501 = vmatprep.mubr.bf16.mxu1 %v326_v18  ;;  %v301_v17 = vld [vmem:[%s3551_s1 + $0x1e0] sm:$0xff]  ;;  %v303_v18 = vld [vmem:[%s3551_s1 + $0x1f0] sm:$0xff]  ;;  %v319_v19 = vpack.c.bf16 %v271_v16, %v269_v15 }
  0x5b   :  { %v335_v20 = vpack.c.bf16 %v303_v18, %v301_v17 }
  0x61   :  { %422 = vmatmul.mubr.bf16.gmra.mrb[8].mxu0 %v309_v29  ;;  %502 = vmatmul.mubr.bf16.gmra.mrb[8].mxu1 %v325_v32 }
  0x62   :  { %431 = vmatprep.mubr.bf16.mxu0 %v312_v44  ;;  %511 = vmatprep.mubr.bf16.mxu1 %v328_v33 }
  0x69   :  { %432 = vmatmul.mubr.bf16.gmra.mrb[12].mxu0 %v311_v41  ;;  %512 = vmatmul.mubr.bf16.gmra.mrb[12].mxu1 %v327_v42 }
  0x6a   :  { %441 = vmatprep.mubr.bf16.mxu0 %v314_v43  ;;  %521 = vmatprep.mubr.bf16.mxu1 %v330_v46 }
  0x71   :  { %442 = vmatmul.mubr.bf16.gmra.mrb[16].mxu0 %v313_v56  ;;  %522 = vmatmul.mubr.bf16.gmra.mrb[16].mxu1 %v329_v1 }
  0x72   :  { %451 = vmatprep.mubr.bf16.mxu0 %v316_v8  ;;  %531 = vmatprep.mubr.bf16.mxu1 %v332_v24 }
  0x79   :  { %452 = vmatmul.mubr.bf16.gmra.mrb[20].mxu0 %v315_v62  ;;  %532 = vmatmul.mubr.bf16.gmra.mrb[20].mxu1 %v331_v63 }
  0x7a   :  { %461 = vmatprep.mubr.bf16.mxu0 %v318_v0  ;;  %541 = vmatprep.mubr.bf16.mxu1 %v334_v2 }
  0x81   :  { %462 = vmatmul.mubr.bf16.gmra.mrb[24].mxu0 %v317_v11  ;;  %542 = vmatmul.mubr.bf16.gmra.mrb[24].mxu1 %v333_v12 }
  0x82   :  { %471 = vmatprep.mubr.bf16.mxu0 %v320_v13  ;;  %551 = vmatprep.mubr.bf16.mxu1 %v336_v14 }
  0x89   :  { %472 = vmatmul.mubr.bf16.gmra.mrb[28].mxu0 %v319_v19  ;;  %552 = vmatmul.mubr.bf16.gmra.mrb[28].mxu1 %v335_v20 }
 0x124   :  { %v2446_v21 = vpop.f32.mrb[0].mxu0  ;;  %v2448_v22 = vpop.f32.mrb[0].mxu1 }
 0x125   :  { %3613 = vst [vmem:[#allocation6_spill] sm:$0xff] %v2448_v22  ;;  %v2450_v25 = vpop.f32.mrb[1].mxu0  ;;  %v2452_v26 = vpop.f32.mrb[1].mxu1  ;;  %v658_v27 = vmul.f32 %v2446_v21, %v2446_v21  ;;  %v690_v28 = vmul.f32 %v2448_v22, %v2448_v22 }
 0x126   :  { %3614 = vst [vmem:[#allocation7_spill] sm:$0xff] %v2452_v26  ;;  %v2458_v29 = vpop.f32.mrb[2].mxu0  ;;  %v2460_v32 = vpop.f32.mrb[2].mxu1  ;;  %v562_v44 = vadd.f32 %v2450_v25, %v2446_v21  ;;  %v610_v33 = vadd.f32 %v2452_v26, %v2448_v22  ;;  %v659_v34 = vmul.f32 %v2450_v25, %v2450_v25  ;;  %v691_v35 = vmul.f32 %v2452_v26, %v2452_v26 }
 0x127   :  { %v2470_v36 = vpop.f32.mrb[3].mxu0  ;;  %v2472_v37 = vpop.f32.mrb[3].mxu1  ;;  %v660_v23 = vmul.f32 %v2458_v29, %v2458_v29  ;;  %v692_v38 = vmul.f32 %v2460_v32, %v2460_v32 }
 0x128   :  { %563 = vadd.xlane.f32.xlu0 %v562_v44  ;;  %v613_v39 = vadd.f32 %v2472_v37, %v2460_v32  ;;  %v661_v40 = vmul.f32 %v2470_v36, %v2470_v36  ;;  %v565_v41 = vadd.f32 %v2470_v36, %v2458_v29  ;;  %v693_v42 = vmul.f32 %v2472_v37, %v2472_v37 }
 0x129   :  { %v722_v43 = vadd.f32 %v659_v34, %v658_v27  ;;  %v770_v46 = vadd.f32 %v691_v35, %v690_v28 }
 0x12a   :  { %614 = vadd.xlane.f32.xlu1 %v613_v39  ;;  %v725_v47 = vadd.f32 %v661_v40, %v660_v23  ;;  %v773_v48 = vadd.f32 %v693_v42, %v692_v38 }
 0x12c   :  { %611 = vadd.xlane.f32.xlu0 %v610_v33  ;;  %v2486_v49 = vpop.f32.mrb[4].mxu0  ;;  %v2488_v50 = vpop.f32.mrb[4].mxu1 }
 0x12d   :  { %v2490_v53 = vpop.f32.mrb[5].mxu0  ;;  %v2492_v54 = vpop.f32.mrb[5].mxu1  ;;  %v662_v51 = vmul.f32 %v2486_v49, %v2486_v49  ;;  %v694_v55 = vmul.f32 %v2488_v50, %v2488_v50 }
 0x12e   :  { %726 = vadd.xlane.f32.xlu1 %v725_v47  ;;  %v568_v56 = vadd.f32 %v2490_v53, %v2486_v49  ;;  %v2500_v1 = vpop.f32.mrb[6].mxu0  ;;  %v2502_v8 = vpop.f32.mrb[6].mxu1  ;;  %v616_v24 = vadd.f32 %v2492_v54, %v2488_v50  ;;  %v663_v31 = vmul.f32 %v2490_v53, %v2490_v53  ;;  %v695_v45 = vmul.f32 %v2492_v54, %v2492_v54 }
 0x12f   :  { %v2510_v52 = vpop.f32.mrb[7].mxu0  ;;  %v2512_v57 = vpop.f32.mrb[7].mxu1  ;;  %v664_v58 = vmul.f32 %v2500_v1, %v2500_v1  ;;  %v696_v59 = vmul.f32 %v2502_v8, %v2502_v8 }
 0x130   :  { %566 = vadd.xlane.f32.xlu0 %v565_v41  ;;  %v571_v60 = vadd.f32 %v2510_v52, %v2500_v1  ;;  %v619_v61 = vadd.f32 %v2512_v57, %v2502_v8  ;;  %v728_v62 = vadd.f32 %v663_v31, %v662_v51  ;;  %v665_v63 = vmul.f32 %v2510_v52, %v2510_v52 }
 0x131   :  { %v776_v0 = vadd.f32 %v695_v45, %v694_v55  ;;  %v697_v2 = vmul.f32 %v2512_v57, %v2512_v57 }
 0x132   :  { %774 = vadd.xlane.f32.xlu1 %v773_v48  ;;  %v731_v3 = vadd.f32 %v665_v63, %v664_v58 }
 0x133   :  { %v2526_v30 = vadd.f32 %v697_v2, %v696_v59 }
 0x134   :  { %723 = vadd.xlane.f32.xlu0 %v722_v43  ;;  %v2528_v4 = vpop.f32.mrb[8].mxu0  ;;  %v2530_v5 = vpop.f32.mrb[8].mxu1 }
 0x135   :  { %3615 = vst [vmem:[#allocation8_spill] sm:$0xff] %v2528_v4  ;;  %3616 = vst [vmem:[#allocation9_spill] sm:$0xff] %v2530_v5  ;;  %v2532_v6 = vpop.f32.mrb[9].mxu0  ;;  %v2534_v7 = vpop.f32.mrb[9].mxu1  ;;  %v666_v9 = vmul.f32 %v2528_v4, %v2528_v4  ;;  %v698_v10 = vmul.f32 %v2530_v5, %v2530_v5 }
 0x136   :  { %3617 = vst [vmem:[#allocation10_spill] sm:$0xff] %v2532_v6  ;;  %3618 = vst [vmem:[#allocation11_spill] sm:$0xff] %v2534_v7  ;;  %569 = vadd.xlane.f32.xlu1 %v568_v56  ;;  %v2540_v11 = vpop.f32.mrb[10].mxu0  ;;  %v2544_v12 = vadd.f32 %v2532_v6, %v2528_v4  ;;  %v2546_v13 = vpop.f32.mrb[10].mxu1  ;;  %v2550_v14 = vadd.f32 %v2534_v7, %v2530_v5  ;;  %v667_v15 = vmul.f32 %v2532_v6, %v2532_v6 }
 0x137   :  { %3619 = vst [vmem:[#allocation12_spill] sm:$0xff] %v2546_v13  ;;  %v699_v16 = vmul.f32 %v2534_v7, %v2534_v7  ;;  %v2556_v17 = vpop.f32.mrb[11].mxu0  ;;  %v2558_v18 = vpop.f32.mrb[11].mxu1  ;;  %v668_v19 = vmul.f32 %v2540_v11, %v2540_v11  ;;  %v700_v20 = vmul.f32 %v2546_v13, %v2546_v13 }
 0x138   :  { %3620 = vst [vmem:[#allocation13_spill] sm:$0xff] %v2558_v18  ;;  %771 = vadd.xlane.f32.xlu0 %v770_v46  ;;  %v577_v27 = vadd.f32 %v2556_v17, %v2540_v11  ;;  %v2568_v28 = vadd.f32 %v2558_v18, %v2546_v13  ;;  %v2570_v44 = vadd.f32 %v667_v15, %v666_v9 }
 0x139   :  { %v669_v33 = vmul.f32 %v2556_v17, %v2556_v17  ;;  %v2574_v34 = vadd.f32 %v699_v16, %v698_v10  ;;  %v701_v35 = vmul.f32 %v2558_v18, %v2558_v18 }
 0x13a   :  { %572 = vadd.xlane.f32.xlu1 %v571_v60 }
 0x13b   :  { %v2578_v23 = vadd.f32 %v669_v33, %v668_v19  ;;  %v2580_v38 = vadd.f32 %v701_v35, %v700_v20 }
 0x13c   :  { %617 = vadd.xlane.f32.xlu0 %v616_v24  ;;  %v2582_v39 = vpop.f32.mrb[12].mxu0  ;;  %v2584_v40 = vpop.f32.mrb[12].mxu1 }
 0x13d   :  { %3621 = vst [vmem:[#allocation14_spill] sm:$0xff] %v2582_v39  ;;  %3622 = vst [vmem:[#allocation15_spill] sm:$0xff] %v2584_v40  ;;  %v2586_v41 = vpop.f32.mrb[13].mxu0  ;;  %v2588_v42 = vpop.f32.mrb[13].mxu1  ;;  %v670_v43 = vmul.f32 %v2582_v39, %v2582_v39  ;;  %v702_v46 = vmul.f32 %v2584_v40, %v2584_v40 }
 0x13e   :  { %3623 = vst [vmem:[#allocation16_spill] sm:$0xff] %v2586_v41  ;;  %3624 = vst [vmem:[#allocation17_spill] sm:$0xff] %v2588_v42  ;;  %620 = vadd.xlane.f32.xlu1 %v619_v61  ;;  %v2594_v47 = vpop.f32.mrb[14].mxu0  ;;  %v2598_v48 = vadd.f32 %v2586_v41, %v2582_v39  ;;  %v2600_v51 = vpop.f32.mrb[14].mxu1  ;;  %v2604_v55 = vadd.f32 %v2588_v42, %v2584_v40  ;;  %v671_v56 = vmul.f32 %v2586_v41, %v2586_v41 }
 0x13f   :  { %3625 = vst [vmem:[#allocation18_spill] sm:$0xff] %v2594_v47  ;;  %3626 = vst [vmem:[#allocation19_spill] sm:$0xff] %v2600_v51  ;;  %v703_v24 = vmul.f32 %v2588_v42, %v2588_v42  ;;  %v2610_v31 = vpop.f32.mrb[15].mxu0  ;;  %v2612_v45 = vpop.f32.mrb[15].mxu1  ;;  %v672_v58 = vmul.f32 %v2594_v47, %v2594_v47  ;;  %v704_v59 = vmul.f32 %v2600_v51, %v2600_v51 }
 0x140   :  { %3627 = vst [vmem:[#allocation20_spill] sm:$0xff] %v2610_v31  ;;  %3628 = vst [vmem:[#allocation21_spill] sm:$0xff] %v2612_v45  ;;  %729 = vadd.xlane.f32.xlu0 %v728_v62  ;;  %v2620_v60 = vadd.f32 %v2610_v31, %v2594_v47  ;;  %v2624_v61 = vadd.f32 %v2612_v45, %v2600_v51  ;;  %v2626_v63 = vadd.f32 %v671_v56, %v670_v43 }
 0x141   :  { %v673_v2 = vmul.f32 %v2610_v31, %v2610_v31  ;;  %v2630_v9 = vadd.f32 %v703_v24, %v702_v46  ;;  %v705_v10 = vmul.f32 %v2612_v45, %v2612_v45 }
 0x142   :  { %732 = vadd.xlane.f32.xlu1 %v731_v3 }
 0x143   :  { %v2634_v62 = vadd.f32 %v673_v2, %v672_v58  ;;  %v2636_v15 = vadd.f32 %v705_v10, %v704_v59 }
 0x144   :  { %777 = vadd.xlane.f32.xlu0 %v776_v0  ;;  %v2638_v16 = vpop.f32.mrb[16].mxu0  ;;  %v2640_v19 = vpop.f32.mrb[16].mxu1 }
 0x145   :  { %3629 = vst [vmem:[#allocation22_spill] sm:$0xff] %v2638_v16  ;;  %3630 = vst [vmem:[#allocation23_spill] sm:$0xff] %v2640_v19  ;;  %v2642_v20 = vpop.f32.mrb[17].mxu0  ;;  %v2644_v33 = vpop.f32.mrb[17].mxu1  ;;  %v674_v35 = vmul.f32 %v2638_v16, %v2638_v16  ;;  %v706_v43 = vmul.f32 %v2640_v19, %v2640_v19 }
 0x146   :  { %3631 = vst [vmem:[#allocation24_spill] sm:$0xff] %v2642_v20  ;;  %3632 = vst [vmem:[#allocation25_spill] sm:$0xff] %v2644_v33  ;;  %780 = vadd.xlane.f32.xlu1 %v2526_v30  ;;  %v2651_v3 = vpop.f32.mrb[18].mxu0  ;;  %v2655_v0 = vadd.f32 %v2642_v20, %v2638_v16  ;;  %v2657_v46 = vpop.f32.mrb[18].mxu1  ;;  %v2661_v56 = vadd.f32 %v2644_v33, %v2640_v19  ;;  %v675_v24 = vmul.f32 %v2642_v20, %v2642_v20 }
 0x147   :  { %3633 = vst [vmem:[#allocation26_spill] sm:$0xff] %v2651_v3  ;;  %3634 = vst [vmem:[#allocation27_spill] sm:$0xff] %v2657_v46  ;;  %v707_v58 = vmul.f32 %v2644_v33, %v2644_v33  ;;  %v2667_v59 = vpop.f32.mrb[19].mxu0  ;;  %v2669_v30 = vpop.f32.mrb[19].mxu1  ;;  %v676_v2 = vmul.f32 %v2651_v3, %v2651_v3  ;;  %v708_v10 = vmul.f32 %v2657_v46, %v2657_v46 }
 0x148   :  { %3635 = vst [vmem:[#allocation28_spill] sm:$0xff] %v2667_v59  ;;  %3636 = vst [vmem:[#allocation29_spill] sm:$0xff] %v2669_v30  ;;  %575 = vadd.xlane.f32.xlu0 %v2544_v12  ;;  %v2678_v26 = vadd.f32 %v2667_v59, %v2651_v3  ;;  %v2682_v22 = vadd.f32 %v2669_v30, %v2657_v46  ;;  %v2684_v33 = vadd.f32 %v675_v24, %v674_v35 }
 0x149   :  { %v677_v19 = vmul.f32 %v2667_v59, %v2667_v59  ;;  %v2688_v20 = vadd.f32 %v707_v58, %v706_v43  ;;  %v709_v16 = vmul.f32 %v2669_v30, %v2669_v30 }
 0x14a   :  { %578 = vadd.xlane.f32.xlu1 %v577_v27 }
 0x14b   :  { %v2692_v12 = vadd.f32 %v677_v19, %v676_v2  ;;  %v2694_v42 = vadd.f32 %v709_v16, %v708_v10 }
 0x14c   :  { %623 = vadd.xlane.f32.xlu0 %v2550_v14  ;;  %v2697_v3 = vpop.f32.mrb[20].mxu0  ;;  %v2699_v46 = vpop.f32.mrb[20].mxu1 }
 0x14d   :  { %3637 = vst [vmem:[#allocation30_spill] sm:$0xff] %v2697_v3  ;;  %3638 = vst [vmem:[#allocation31_spill] sm:$0xff] %v2699_v46  ;;  %v2701_v35 = vpop.f32.mrb[21].mxu0  ;;  %v2703_v24 = vpop.f32.mrb[21].mxu1  ;;  %v678_v43 = vmul.f32 %v2697_v3, %v2697_v3  ;;  %v710_v27 = vmul.f32 %v2699_v46, %v2699_v46 }
 0x14e   :  { %3639 = vst [vmem:[#allocation32_spill] sm:$0xff] %v2701_v35  ;;  %3640 = vst [vmem:[#allocation33_spill] sm:$0xff] %v2703_v24  ;;  %626 = vadd.xlane.f32.xlu1 %v2568_v28  ;;  %v2710_v16 = vpop.f32.mrb[22].mxu0  ;;  %v2714_v14 = vadd.f32 %v2701_v35, %v2697_v3  ;;  %v2716_v19 = vpop.f32.mrb[22].mxu1  ;;  %v2720_v58 = vadd.f32 %v2703_v24, %v2699_v46  ;;  %v679_v2 = vmul.f32 %v2701_v35, %v2701_v35 }
 0x14f   :  { %3641 = vst [vmem:[#allocation34_spill] sm:$0xff] %v2710_v16  ;;  %3642 = vst [vmem:[#allocation35_spill] sm:$0xff] %v2716_v19  ;;  %v711_v10 = vmul.f32 %v2703_v24, %v2703_v24  ;;  %v2726_v30 = vpop.f32.mrb[23].mxu0  ;;  %v2728_v28 = vpop.f32.mrb[23].mxu1  ;;  %v680_v3 = vmul.f32 %v2710_v16, %v2710_v16  ;;  %v712_v59 = vmul.f32 %v2716_v19, %v2716_v19 }
 0x150   :  { %3643 = vst [vmem:[#allocation36_spill] sm:$0xff] %v2726_v30  ;;  %3644 = vst [vmem:[#allocation37_spill] sm:$0xff] %v2728_v28  ;;  %735 = vadd.xlane.f32.xlu0 %v2570_v44  ;;  %v2737_v46 = vadd.f32 %v2726_v30, %v2710_v16  ;;  %v2741_v35 = vadd.f32 %v2728_v28, %v2716_v19  ;;  %v2743_v24 = vadd.f32 %v679_v2, %v678_v43 }
 0x151   :  { %v681_v40 = vmul.f32 %v2726_v30, %v2726_v30  ;;  %v2747_v45 = vadd.f32 %v711_v10, %v710_v27  ;;  %v713_v51 = vmul.f32 %v2728_v28, %v2728_v28 }
 0x152   :  { %738 = vadd.xlane.f32.xlu1 %v2578_v23 }
 0x153   :  { %v2752_v44 = vadd.f32 %v681_v40, %v680_v3  ;;  %v2754_v16 = vadd.f32 %v713_v51, %v712_v59 }
 0x154   :  { %783 = vadd.xlane.f32.xlu0 %v2574_v34  ;;  %v2757_v19 = vpop.f32.mrb[24].mxu0  ;;  %v2759_v43 = vpop.f32.mrb[24].mxu1 }
 0x155   :  { %3645 = vst [vmem:[#allocation38_spill] sm:$0xff] %v2757_v19  ;;  %3646 = vst [vmem:[#allocation39_spill] sm:$0xff] %v2759_v43  ;;  %v2761_v2 = vpop.f32.mrb[25].mxu0  ;;  %v2763_v30 = vpop.f32.mrb[25].mxu1  ;;  %v682_v27 = vmul.f32 %v2757_v19, %v2757_v19  ;;  %v714_v23 = vmul.f32 %v2759_v43, %v2759_v43 }
 0x156   :  { %3647 = vst [vmem:[#allocation40_spill] sm:$0xff] %v2761_v2  ;;  %3648 = vst [vmem:[#allocation41_spill] sm:$0xff] %v2763_v30  ;;  %786 = vadd.xlane.f32.xlu1 %v2580_v38  ;;  %v2770_v40 = vpop.f32.mrb[26].mxu0  ;;  %v2774_v34 = vadd.f32 %v2761_v2, %v2757_v19  ;;  %v2776_v51 = vpop.f32.mrb[26].mxu1  ;;  %v2780_v3 = vadd.f32 %v2763_v30, %v2759_v43  ;;  %v683_v59 = vmul.f32 %v2761_v2, %v2761_v2 }
 0x157   :  { %3649 = vst [vmem:[#allocation42_spill] sm:$0xff] %v2770_v40  ;;  %3650 = vst [vmem:[#allocation43_spill] sm:$0xff] %v2776_v51  ;;  %v715_v10 = vmul.f32 %v2763_v30, %v2763_v30  ;;  %v2786_v28 = vpop.f32.mrb[27].mxu0  ;;  %v2788_v38 = vpop.f32.mrb[27].mxu1  ;;  %v684_v19 = vmul.f32 %v2770_v40, %v2770_v40  ;;  %v716_v41 = vmul.f32 %v2776_v51, %v2776_v51 }
 0x158   :  { %3651 = vst [vmem:[#allocation44_spill] sm:$0xff] %v2786_v28  ;;  %3652 = vst [vmem:[#allocation45_spill] sm:$0xff] %v2788_v38  ;;  %581 = vadd.xlane.f32.xlu0 %v2598_v48  ;;  %v601_v43 = vadd.f32 %v2786_v28, %v2770_v40  ;;  %v649_v2 = vadd.f32 %v2788_v38, %v2776_v51  ;;  %v758_v39 = vadd.f32 %v683_v59, %v682_v27 }
 0x159   :  { %v685_v30 = vmul.f32 %v2786_v28, %v2786_v28  ;;  %v806_v31 = vadd.f32 %v715_v10, %v714_v23  ;;  %v717_v47 = vmul.f32 %v2788_v38, %v2788_v38 }
 0x15a   :  { %584 = vadd.xlane.f32.xlu1 %v2620_v60 }
 0x15b   :  { %v761_v7 = vadd.f32 %v685_v30, %v684_v19  ;;  %v809_v5 = vadd.f32 %v717_v47, %v716_v41 }
 0x15c   :  { %629 = vadd.xlane.f32.xlu0 %v2604_v55  ;;  %v2805_v48 = vpop.f32.mrb[28].mxu0  ;;  %v2807_v40 = vpop.f32.mrb[28].mxu1 }
 0x15d   :  { %3653 = vst [vmem:[#allocation46_spill] sm:$0xff] %v2805_v48  ;;  %3654 = vst [vmem:[#allocation47_spill] sm:$0xff] %v2807_v40  ;;  %v2809_v18 = vpop.f32.mrb[29].mxu0  ;;  %v2811_v27 = vpop.f32.mrb[29].mxu1  ;;  %v686_v23 = vmul.f32 %v2805_v48, %v2805_v48  ;;  %v718_v59 = vmul.f32 %v2807_v40, %v2807_v40 }
 0x15e   :  { %3655 = vst [vmem:[#allocation48_spill] sm:$0xff] %v2809_v18  ;;  %3656 = vst [vmem:[#allocation49_spill] sm:$0xff] %v2811_v27  ;;  %632 = vadd.xlane.f32.xlu1 %v2624_v61  ;;  %v2818_v60 = vpop.f32.mrb[30].mxu0  ;;  %v604_v41 = vadd.f32 %v2809_v18, %v2805_v48  ;;  %v2822_v47 = vpop.f32.mrb[30].mxu1  ;;  %v652_v55 = vadd.f32 %v2811_v27, %v2807_v40  ;;  %v687_v30 = vmul.f32 %v2809_v18, %v2809_v18 }
 0x15f   :  { %3657 = vst [vmem:[#allocation50_spill] sm:$0xff] %v2818_v60  ;;  %3658 = vst [vmem:[#allocation51_spill] sm:$0xff] %v2822_v47  ;;  %v719_v19 = vmul.f32 %v2811_v27, %v2811_v27  ;;  %v2830_v10 = vpop.f32.mrb[31].mxu0  ;;  %v2832_v38 = vpop.f32.mrb[31].mxu1  ;;  %v688_v61 = vmul.f32 %v2818_v60, %v2818_v60  ;;  %v720_v48 = vmul.f32 %v2822_v47, %v2822_v47 }
 0x160   :  { %3659 = vst [vmem:[#allocation52_spill] sm:$0xff] %v2830_v10  ;;  %3660 = vst [vmem:[#allocation53_spill] sm:$0xff] %v2832_v38  ;;  %741 = vadd.xlane.f32.xlu0 %v2626_v63  ;;  %v689_v40 = vmul.f32 %v2830_v10, %v2830_v10  ;;  %v607_v18 = vadd.f32 %v2830_v10, %v2818_v60  ;;  %v721_v27 = vmul.f32 %v2832_v38, %v2832_v38 }
 0x161   :  { %v655_v51 = vadd.f32 %v2832_v38, %v2822_v47  ;;  %v764_v28 = vadd.f32 %v687_v30, %v686_v23  ;;  %v812_v13 = vadd.f32 %v719_v19, %v718_v59 }
 0x162   :  { %744 = vadd.xlane.f32.xlu1 %v2634_v62  ;;  %v767_v6 = vadd.f32 %v689_v40, %v688_v61  ;;  %v815_v4 = vadd.f32 %v721_v27, %v720_v48 }
 0x164   :  { %789 = vadd.xlane.f32.xlu0 %v2630_v9 }
 0x166   :  { %792 = vadd.xlane.f32.xlu1 %v2636_v15 }
 0x168   :  { %587 = vadd.xlane.f32.xlu0 %v2655_v0 }
 0x16a   :  { %590 = vadd.xlane.f32.xlu1 %v2678_v26 }
 0x16c   :  { %635 = vadd.xlane.f32.xlu0 %v2661_v56 }
 0x16e   :  { %638 = vadd.xlane.f32.xlu1 %v2682_v22 }
 0x170   :  { %747 = vadd.xlane.f32.xlu0 %v2684_v33 }
 0x172   :  { %750 = vadd.xlane.f32.xlu1 %v2692_v12 }
 0x174   :  { %795 = vadd.xlane.f32.xlu0 %v2688_v20 }
 0x176   :  { %798 = vadd.xlane.f32.xlu1 %v2694_v42 }
 0x178   :  { %593 = vadd.xlane.f32.xlu0 %v2714_v14 }
 0x17a   :  { %596 = vadd.xlane.f32.xlu1 %v2737_v46 }
 0x17c   :  { %641 = vadd.xlane.f32.xlu0 %v2720_v58 }
 0x17e   :  { %644 = vadd.xlane.f32.xlu1 %v2741_v35 }
 0x180   :  { %753 = vadd.xlane.f32.xlu0 %v2743_v24 }
 0x182   :  { %756 = vadd.xlane.f32.xlu1 %v2752_v44 }
 0x184   :  { %801 = vadd.xlane.f32.xlu0 %v2747_v45 }
 0x186   :  { %804 = vadd.xlane.f32.xlu1 %v2754_v16 }
 0x188   :  { %599 = vadd.xlane.f32.xlu0 %v2774_v34 }
 0x18a   :  { %602 = vadd.xlane.f32.xlu1 %v601_v43 }
 0x18c   :  { %647 = vadd.xlane.f32.xlu0 %v2780_v3 }
 0x18e   :  { %650 = vadd.xlane.f32.xlu1 %v649_v2 }
 0x190   :  { %759 = vadd.xlane.f32.xlu0 %v758_v39 }
 0x192   :  { %762 = vadd.xlane.f32.xlu1 %v761_v7 }
 0x194   :  { %807 = vadd.xlane.f32.xlu0 %v806_v31 }
 0x196   :  { %810 = vadd.xlane.f32.xlu1 %v809_v5 }
 0x198   :  { %605 = vadd.xlane.f32.xlu0 %v604_v41 }
 0x19a   :  { %608 = vadd.xlane.f32.xlu1 %v607_v18 }
 0x19c   :  { %653 = vadd.xlane.f32.xlu0 %v652_v55 }
 0x19e   :  { %656 = vadd.xlane.f32.xlu1 %v655_v51 }
 0x1a0   :  { %765 = vadd.xlane.f32.xlu0 %v764_v28 }
 0x1a2   :  { %768 = vadd.xlane.f32.xlu1 %v767_v6 }
 0x1a4   :  { %813 = vadd.xlane.f32.xlu0 %v812_v13 }
 0x1a6   :  { %816 = vadd.xlane.f32.xlu1 %v815_v4 }
 0x1b5   :  { %v564_v22 = vpop.xlane.xlu0 %563 }
 0x1b6   :  { %v2868_v9 = vmul.f32 0.0051020407, %v564_v22 }
 0x1b7   :  { %v615_v26 = vpop.xlane.xlu1 %614 }
 0x1b8   :  { %v882_v5 = vmul.f32 %v2868_v9, %v2868_v9  ;;  %v2874_v18 = vmul.f32 0.0051020407, %v615_v26 }
 0x1b9   :  { %v612_v42 = vpop.xlane.xlu0 %611 }
 0x1ba   :  { %v2878_v13 = vmul.f32 0.0051020407, %v612_v42  ;;  %v899_v46 = vmul.f32 %v2874_v18, %v2874_v18 }
 0x1bb   :  { %v727_v45 = vpop.xlane.xlu1 %726 }
 0x1bc   :  { %v851_v15 = vmul.f32 0.0051020407, %v727_v45  ;;  %v898_v35 = vmul.f32 %v2878_v13, %v2878_v13 }
 0x1bd   :  { %v567_v63 = vpop.xlane.xlu0 %566 }
 0x1be   :  { %v2870_v62 = vmul.f32 0.0051020407, %v567_v63 }
 0x1bf   :  { %v775_v7 = vpop.xlane.xlu1 %774 }
 0x1c0   :  { %v883_v6 = vmul.f32 %v2870_v62, %v2870_v62  ;;  %v867_v20 = vmul.f32 0.0051020407, %v775_v7 }
 0x1c1   :  { %v724_v39 = vpop.xlane.xlu0 %723 }
 0x1c2   :  { %v850_v4 = vmul.f32 0.0051020407, %v724_v39  ;;  %v915_v56 = vsub.f32 %v851_v15, %v883_v6  ;;  %v931_v14 = vsub.f32 %v867_v20, %v899_v46  ;;  %v2903_v6 = vld [vmem:[%s3552_s2] sm:$0xff] }
 0x1c3   :  { %v570_v31 = vpop.xlane.xlu1 %569 }
 0x1c4   :  { %v914_v33 = vsub.f32 %v850_v4, %v882_v5  ;;  %v2884_v28 = vmul.f32 0.0051020407, %v570_v31  ;;  %v947_v2 = vmax.f32 %v915_v56, 0.0  ;;  %v963_v3 = vmax.f32 %v931_v14, 0.0 }
 0x1c5   :  { %v772_v0 = vpop.xlane.xlu0 %771 }
 0x1c6   :  { %v946_v12 = vmax.f32 %v914_v33, 0.0  ;;  %v866_v24 = vmul.f32 0.0051020407, %v772_v0  ;;  %v884_v27 = vmul.f32 %v2884_v28, %v2884_v28  ;;  %v979_v41 = vadd.f32 1e-05, %v947_v2 }
 0x1c7   :  { %v573_v16 = vpop.xlane.xlu1 %572  ;;  %v995_v22 = vadd.f32 1e-05, %v963_v3 }
 0x1c8   :  { %v978_v58 = vadd.f32 1e-05, %v946_v12  ;;  %v930_v44 = vsub.f32 %v866_v24, %v898_v35  ;;  %v2886_v40 = vmul.f32 0.0051020407, %v573_v16 }
 0x1c9   :  { %v618_v43 = vpop.xlane.xlu0 %617 }
 0x1ca   :  { %1868 = vrsqrt.f32 %v978_v58  ;;  %v962_v34 = vmax.f32 %v930_v44, 0.0  ;;  %v2888_v48 = vmul.f32 0.0051020407, %v618_v43  ;;  %v885_v55 = vmul.f32 %v2886_v40, %v2886_v40  ;;  %v2911_v58 = vld [vmem:[%s3552_s2 + $0x80] sm:$0xff] }
 0x1cb   :  { %v621_v51 = vpop.xlane.xlu1 %620 }
 0x1cc   :  { %v994_v23 = vadd.f32 1e-05, %v962_v34  ;;  %v2894_v30 = vmul.f32 0.0051020407, %v621_v51  ;;  %v900_v26 = vmul.f32 %v2888_v48, %v2888_v48 }
 0x1cd   :  { %v730_v59 = vpop.xlane.xlu0 %729 }
 0x1ce   :  { %v852_v19 = vmul.f32 0.0051020407, %v730_v59  ;;  %1870 = vrsqrt.f32 %v994_v23  ;;  %v901_v7 = vmul.f32 %v2894_v30, %v2894_v30 }
 0x1cf   :  { %v733_v61 = vpop.xlane.xlu1 %732  ;;  %1872 = vrsqrt.f32 %v979_v41 }
 0x1d0   :  { %v853_v42 = vmul.f32 0.0051020407, %v733_v61  ;;  %v916_v45 = vsub.f32 %v852_v19, %v884_v27  ;;  %1874 = vrsqrt.f32 %v995_v22 }
 0x1d1   :  { %v778_v63 = vpop.xlane.xlu0 %777 }
 0x1d2   :  { %v917_v39 = vsub.f32 %v853_v42, %v885_v55  ;;  %v868_v5 = vmul.f32 0.0051020407, %v778_v63  ;;  %v948_v33 = vmax.f32 %v916_v45, 0.0  ;;  %v2921_v55 = vld [vmem:[%s3552_s2 + $0x8] sm:$0xff] }
 0x1d3   :  { %v781_v4 = vpop.xlane.xlu1 %780 }
 0x1d4   :  { %v1869_v31 = vpop.eup %1868  ;;  %v932_v15 = vsub.f32 %v868_v5, %v900_v26  ;;  %v869_v20 = vmul.f32 0.0051020407, %v781_v4  ;;  %v949_v56 = vmax.f32 %v917_v39, 0.0  ;;  %v980_v43 = vadd.f32 1e-05, %v948_v33  ;;  %v2935_v39 = vld [vmem:[%s3552_s2 + $0x88] sm:$0xff] }
 0x1d5   :  { %v576_v0 = vpop.xlane.xlu0 %575  ;;  %v1074_v46 = vmul.f32 %v1869_v31, %v2903_v6 }
 0x1d6   :  { %v964_v12 = vmax.f32 %v932_v15, 0.0  ;;  %v933_v35 = vsub.f32 %v869_v20, %v901_v7  ;;  %v2906_v14 = vmul.f32 0.0051020407, %v576_v0  ;;  %v981_v3 = vadd.f32 1e-05, %v949_v56 }
 0x1d7   :  { %v579_v24 = vpop.xlane.xlu1 %578  ;;  %1300 = vperm.xlu0 %1864, %v1074_v46   ;;  %v1106_v51 = vmul.f32 %v1074_v46, %v2868_v9 }
 0x1d8   :  { %v996_v16 = vadd.f32 1e-05, %v964_v12  ;;  %v1871_v44 = vpop.eup %1870  ;;  %v965_v2 = vmax.f32 %v933_v35, 0.0  ;;  %v2914_v27 = vmul.f32 0.0051020407, %v579_v24  ;;  %v886_v19 = vmul.f32 %v2906_v14, %v2906_v14  ;;  %v2947_v35 = vld [vmem:[%s3552_s2 + $0x90] sm:$0xff] }
 0x1d9   :  { %v624_v34 = vpop.xlane.xlu0 %623  ;;  %v1090_v59 = vmul.f32 %v1871_v44, %v2911_v58  ;;  %v1873_v41 = vpop.eup %1872 }
 0x1da   :  { %1876 = vrsqrt.f32 %v996_v16  ;;  %v2925_v9 = vmul.f32 0.0051020407, %v624_v34  ;;  %v997_v61 = vadd.f32 1e-05, %v965_v2  ;;  %v1875_v42 = vpop.eup %1874  ;;  %v887_v45 = vmul.f32 %v2914_v27, %v2914_v27 }
 0x1db   :  { %v627_v23 = vpop.xlane.xlu1 %626  ;;  %1170 = vrot.lane.b32.xlu0 %v1106_v51, %s1957_s23  ;;  %1878 = vrsqrt.f32 %v980_v43  ;;  %1380 = vperm.xlu1 %1865, %v1090_v59   ;;  %v1122_v26 = vmul.f32 %v1090_v59, %v2878_v13  ;;  %v1075_v5 = vmul.f32 %v1873_v41, %v2921_v55  ;;  %v1091_v33 = vmul.f32 %v1875_v42, %v2935_v39 }
 0x1dc   :  { %1880 = vrsqrt.f32 %v981_v3  ;;  %v2930_v63 = vmul.f32 0.0051020407, %v627_v23  ;;  %v902_v13 = vmul.f32 %v2925_v9, %v2925_v9 }
 0x1dd   :  { %v736_v22 = vpop.xlane.xlu0 %735  ;;  %1882 = vrsqrt.f32 %v997_v61  ;;  %v1107_v24 = vmul.f32 %v1075_v5, %v2870_v62 }
 0x1de   :  { %v854_v7 = vmul.f32 0.0051020407, %v736_v22  ;;  %v903_v0 = vmul.f32 %v2930_v63, %v2930_v63  ;;  %v1123_v22 = vmul.f32 %v1091_v33, %v2874_v18 }
 0x1df   :  { %v739_v4 = vpop.xlane.xlu1 %738  ;;  %1202 = vrot.lane.b32.xlu0 %v1122_v26, %s1957_s23  ;;  %1305 = vperm.xlu1 %1865, %v1075_v5   ;;  %v2964_v5 = vld [vmem:[%s3552_s2 + $0x18] sm:$0xff] }
 0x1e0   :  { %v918_v31 = vsub.f32 %v854_v7, %v886_v19  ;;  %v855_v15 = vmul.f32 0.0051020407, %v739_v4  ;;  %v2959_v7 = vld [vmem:[%s3552_s2 + $0x10] sm:$0xff] }
 0x1e1   :  { %v784_v20 = vpop.xlane.xlu0 %783 }
 0x1e2   :  { %v950_v46 = vmax.f32 %v918_v31, 0.0  ;;  %v919_v56 = vsub.f32 %v855_v15, %v887_v45  ;;  %v870_v12 = vmul.f32 0.0051020407, %v784_v20 }
 0x1e3   :  { %v787_v16 = vpop.xlane.xlu1 %786  ;;  %1385 = vperm.xlu0 %1864, %v1091_v33   ;;  %1172 = vrot.lane.b32.xlu1 %v1107_v24, %s1957_s23 }
 0x1e4   :  { %v1877_v44 = vpop.eup %1876  ;;  %v982_v43 = vadd.f32 1e-05, %v950_v46  ;;  %v934_v2 = vsub.f32 %v870_v12, %v902_v13  ;;  %v871_v34 = vmul.f32 0.0051020407, %v787_v16  ;;  %v951_v23 = vmax.f32 %v919_v56, 0.0  ;;  %v2979_v56 = vld [vmem:[%s3552_s2 + $0x98] sm:$0xff] }
 0x1e5   :  { %v582_v51 = vpop.xlane.xlu0 %581  ;;  %v1092_v3 = vmul.f32 %v1877_v44, %v2947_v35  ;;  %v1879_v19 = vpop.eup %1878 }
 0x1e6   :  { %1884 = vrsqrt.f32 %v982_v43  ;;  %v966_v59 = vmax.f32 %v934_v2, 0.0  ;;  %v935_v41 = vsub.f32 %v871_v34, %v903_v0  ;;  %v1881_v26 = vpop.eup %1880  ;;  %v2954_v45 = vmul.f32 0.0051020407, %v582_v51  ;;  %v2988_v2 = vld [vmem:[%s3552_s2 + $0x20] sm:$0xff] }
 0x1e7   :  { %v585_v61 = vpop.xlane.xlu1 %584  ;;  %v1124_v62 = vmul.f32 %v1092_v3, %v2888_v48  ;;  %1204 = vrot.lane.b32.xlu1 %v1123_v22, %s1957_s23  ;;  %v983_v48 = vadd.f32 1e-05, %v951_v23  ;;  %v1883_v31 = vpop.eup %1882  ;;  %v1076_v20 = vmul.f32 %v1879_v19, %v2959_v7  ;;  %v1077_v33 = vmul.f32 %v1881_v26, %v2964_v5 }
 0x1e8   :  { %v998_v42 = vadd.f32 1e-05, %v966_v59  ;;  %v967_v4 = vmax.f32 %v935_v41, 0.0  ;;  %v2968_v13 = vmul.f32 0.0051020407, %v585_v61  ;;  %v888_v0 = vmul.f32 %v2954_v45, %v2954_v45 }
 0x1e9   :  { %v630_v18 = vpop.xlane.xlu0 %629  ;;  %1206 = vrot.lane.b32.xlu0 %v1124_v62, %s1957_s23  ;;  %v1093_v51 = vmul.f32 %v1883_v31, %v2979_v56  ;;  %v1108_v31 = vmul.f32 %v1076_v20, %v2884_v28  ;;  %v1109_v28 = vmul.f32 %v1077_v33, %v2886_v40 }
 0x1ea   :  { %1886 = vrsqrt.f32 %v998_v42  ;;  %v2974_v46 = vmul.f32 0.0051020407, %v630_v18  ;;  %v999_v12 = vadd.f32 1e-05, %v967_v4  ;;  %v889_v16 = vmul.f32 %v2968_v13, %v2968_v13  ;;  %v2999_v18 = vld [vmem:[%s3552_s2 + $0xa0] sm:$0xff] }
 0x1eb   :  { %v633_v15 = vpop.xlane.xlu1 %632  ;;  %1310 = vperm.xlu1 %1865, %v1076_v20   ;;  %1888 = vrsqrt.f32 %v983_v48 }
 0x1ec   :  { %v2983_v44 = vmul.f32 0.0051020407, %v633_v15  ;;  %v904_v59 = vmul.f32 %v2974_v46, %v2974_v46  ;;  %1890 = vrsqrt.f32 %v999_v12 }
 0x1ed   :  { %v742_v24 = vpop.xlane.xlu0 %741  ;;  %1315 = vperm.xlu0 %1864, %v1077_v33  }
 0x1ee   :  { %v856_v43 = vmul.f32 0.0051020407, %v742_v24  ;;  %v905_v62 = vmul.f32 %v2983_v44, %v2983_v44 }
 0x1ef   :  { %v745_v34 = vpop.xlane.xlu1 %744  ;;  %1390 = vperm.xlu1 %1865, %v1092_v3  }
 0x1f0   :  { %v1885_v23 = vpop.eup %1884  ;;  %v920_v41 = vsub.f32 %v856_v43, %v888_v0  ;;  %v857_v19 = vmul.f32 0.0051020407, %v745_v34 }
 0x1f1   :  { %v790_v61 = vpop.xlane.xlu0 %789  ;;  %1395 = vperm.xlu0 %1864, %v1093_v51   ;;  %v1078_v22 = vmul.f32 %v1885_v23, %v2988_v2 }
 0x1f2   :  { %v952_v26 = vmax.f32 %v920_v41, 0.0  ;;  %v921_v42 = vsub.f32 %v857_v19, %v889_v16  ;;  %v872_v4 = vmul.f32 0.0051020407, %v790_v61 }
 0x1f3   :  { %v793_v48 = vpop.xlane.xlu1 %792  ;;  %v1110_v3 = vmul.f32 %v1078_v22, %v2906_v14  ;;  %1174 = vrot.lane.b32.xlu1 %v1108_v31, %s1957_s23 }
 0x1f4   :  { %v1887_v15 = vpop.eup %1886  ;;  %v984_v0 = vadd.f32 1e-05, %v952_v26  ;;  %v936_v12 = vsub.f32 %v872_v4, %v904_v59  ;;  %v873_v24 = vmul.f32 0.0051020407, %v793_v48  ;;  %v953_v34 = vmax.f32 %v921_v42, 0.0  ;;  %v3013_v26 = vld [vmem:[%s3552_s2 + $0x28] sm:$0xff] }
 0x1f5   :  { %v588_v43 = vpop.xlane.xlu0 %587  ;;  %1178 = vrot.lane.b32.xlu0 %v1110_v3, %s1957_s23  ;;  %v1094_v16 = vmul.f32 %v1887_v15, %v2999_v18  ;;  %v1889_v20 = vpop.eup %1888  ;;  %v1125_v48 = vmul.f32 %v1093_v51, %v2894_v30 }
 0x1f6   :  { %1892 = vrsqrt.f32 %v984_v0  ;;  %v968_v23 = vmax.f32 %v936_v12, 0.0  ;;  %v937_v41 = vsub.f32 %v873_v24, %v905_v62  ;;  %v3008_v59 = vmul.f32 0.0051020407, %v588_v43  ;;  %v3028_v0 = vld [vmem:[%s3552_s2 + $0xa8] sm:$0xff] }
 0x1f7   :  { %v591_v19 = vpop.xlane.xlu1 %590  ;;  %v1126_v14 = vmul.f32 %v1094_v16, %v2925_v9  ;;  %1176 = vrot.lane.b32.xlu1 %v1109_v28, %s1957_s23  ;;  %v985_v62 = vadd.f32 1e-05, %v953_v34  ;;  %v1891_v9 = vpop.eup %1890  ;;  %v1079_v31 = vmul.f32 %v1889_v20, %v3013_v26  ;;  %3661 = vst [vmem:[#allocation54_spill] sm:$0xff] %v3028_v0  ;;  %v3038_v34 = vld [vmem:[%s3552_s2 + $0x30] sm:$0xff] }
 0x1f8   :  { %v1000_v61 = vadd.f32 1e-05, %v968_v23  ;;  %v969_v4 = vmax.f32 %v937_v41, 0.0  ;;  %v3017_v40 = vmul.f32 0.0051020407, %v591_v19  ;;  %v890_v3 = vmul.f32 %v3008_v59, %v3008_v59 }
 0x1f9   :  { %v636_v42 = vpop.xlane.xlu0 %635  ;;  %1210 = vrot.lane.b32.xlu0 %v1126_v14, %s1957_s23  ;;  %v1095_v41 = vmul.f32 %v1891_v9, %v3028_v0  ;;  %v3049_v9 = vld [vmem:[%s3552_s2 + $0xb0] sm:$0xff]  ;;  %v1111_v47 = vmul.f32 %v1079_v31, %v2914_v27 }
 0x1fa   :  { %1894 = vrsqrt.f32 %v1000_v61  ;;  %v3023_v15 = vmul.f32 0.0051020407, %v636_v42  ;;  %v1001_v12 = vadd.f32 1e-05, %v969_v4  ;;  %v891_v30 = vmul.f32 %v3017_v40, %v3017_v40 }
 0x1fb   :  { %v639_v33 = vpop.xlane.xlu1 %638  ;;  %1208 = vrot.lane.b32.xlu1 %v1125_v48, %s1957_s23  ;;  %1896 = vrsqrt.f32 %v985_v62 }
 0x1fc   :  { %v3033_v51 = vmul.f32 0.0051020407, %v639_v33  ;;  %v906_v28 = vmul.f32 %v3023_v15, %v3023_v15  ;;  %1898 = vrsqrt.f32 %v1001_v12 }
 0x1fd   :  { %v748_v24 = vpop.xlane.xlu0 %747  ;;  %1325 = vperm.xlu0 %1864, %v1079_v31  }
 0x1fe   :  { %v858_v43 = vmul.f32 0.0051020407, %v748_v24  ;;  %v907_v42 = vmul.f32 %v3033_v51, %v3033_v51 }
 0x1ff   :  { %v751_v23 = vpop.xlane.xlu1 %750  ;;  %1320 = vperm.xlu1 %1865, %v1078_v22  }
 0x200   :  { %v1893_v19 = vpop.eup %1892  ;;  %v922_v14 = vsub.f32 %v858_v43, %v890_v3  ;;  %v859_v20 = vmul.f32 0.0051020407, %v751_v23 }
 0x201   :  { %v796_v61 = vpop.xlane.xlu0 %795  ;;  %1405 = vperm.xlu0 %1864, %v1095_v41   ;;  %v1080_v4 = vmul.f32 %v1893_v19, %v3038_v34 }
 0x202   :  { %v954_v62 = vmax.f32 %v922_v14, 0.0  ;;  %v923_v33 = vsub.f32 %v859_v20, %v891_v30  ;;  %v874_v48 = vmul.f32 0.0051020407, %v796_v61 }
 0x203   :  { %v799_v24 = vpop.xlane.xlu1 %798  ;;  %v1112_v3 = vmul.f32 %v1080_v4, %v2954_v45  ;;  %1400 = vperm.xlu1 %1865, %v1094_v16   ;;  %v3061_v16 = vld [vmem:[%s3552_s2 + $0x38] sm:$0xff] }
 0x204   :  { %v1895_v12 = vpop.eup %1894  ;;  %v986_v22 = vadd.f32 1e-05, %v954_v62  ;;  %v938_v43 = vsub.f32 %v874_v48, %v906_v28  ;;  %v875_v23 = vmul.f32 0.0051020407, %v799_v24  ;;  %v955_v30 = vmax.f32 %v923_v33, 0.0  ;;  %3662 = vst [vmem:[#allocation55_spill] sm:$0xff] %v3061_v16 }
 0x205   :  { %v594_v19 = vpop.xlane.xlu0 %593  ;;  %1182 = vrot.lane.b32.xlu0 %v1112_v3, %s1957_s23  ;;  %v1096_v14 = vmul.f32 %v1895_v12, %v3049_v9  ;;  %v1897_v45 = vpop.eup %1896  ;;  %v1127_v48 = vmul.f32 %v1095_v41, %v2930_v63 }
 0x206   :  { %1900 = vrsqrt.f32 %v986_v22  ;;  %v970_v20 = vmax.f32 %v938_v43, 0.0  ;;  %v939_v61 = vsub.f32 %v875_v23, %v907_v42  ;;  %v3056_v62 = vmul.f32 0.0051020407, %v594_v19  ;;  %v3086_v22 = vld [vmem:[%s3552_s2 + $0x40] sm:$0xff] }
 0x207   :  { %v597_v38 = vpop.xlane.xlu1 %596  ;;  %v1128_v10 = vmul.f32 %v1096_v14, %v2974_v46  ;;  %1180 = vrot.lane.b32.xlu1 %v1111_v47, %s1957_s23  ;;  %v987_v42 = vadd.f32 1e-05, %v955_v30  ;;  %v1899_v46 = vpop.eup %1898  ;;  %v1081_v24 = vmul.f32 %v1897_v45, %v3061_v16  ;;  %v3076_v47 = vld [vmem:[%s3552_s2 + $0xb8] sm:$0xff]  ;;  %3664 = vst [vmem:[#allocation57_spill] sm:$0xff] %v3086_v22 }
 0x208   :  { %v1002_v60 = vadd.f32 1e-05, %v970_v20  ;;  %v971_v28 = vmax.f32 %v939_v61, 0.0  ;;  %v3065_v27 = vmul.f32 0.0051020407, %v597_v38  ;;  %v892_v3 = vmul.f32 %v3056_v62, %v3056_v62  ;;  %3663 = vst [vmem:[#allocation56_spill] sm:$0xff] %v3076_v47 }
 0x209   :  { %v642_v33 = vpop.xlane.xlu0 %641  ;;  %1214 = vrot.lane.b32.xlu0 %v1128_v10, %s1957_s23  ;;  %v1097_v23 = vmul.f32 %v1899_v46, %v3076_v47  ;;  %v3097_v46 = vld [vmem:[%s3552_s2 + $0xc0] sm:$0xff]  ;;  %v1113_v16 = vmul.f32 %v1081_v24, %v2968_v13 }
 0x20a   :  { %1902 = vrsqrt.f32 %v1002_v60  ;;  %v3071_v12 = vmul.f32 0.0051020407, %v642_v33  ;;  %v1003_v10 = vadd.f32 1e-05, %v971_v28  ;;  %v893_v60 = vmul.f32 %v3065_v27, %v3065_v27  ;;  %3665 = vst [vmem:[#allocation58_spill] sm:$0xff] %v3097_v46 }
 0x20b   :  { %v645_v31 = vpop.xlane.xlu1 %644  ;;  %1212 = vrot.lane.b32.xlu1 %v1127_v48, %s1957_s23  ;;  %1904 = vrsqrt.f32 %v987_v42 }
 0x20c   :  { %v3081_v63 = vmul.f32 0.0051020407, %v645_v31  ;;  %v908_v30 = vmul.f32 %v3071_v12, %v3071_v12  ;;  %1906 = vrsqrt.f32 %v1003_v10 }
 0x20d   :  { %v754_v38 = vpop.xlane.xlu0 %753  ;;  %1335 = vperm.xlu0 %1864, %v1081_v24  }
 0x20e   :  { %v860_v41 = vmul.f32 0.0051020407, %v754_v38  ;;  %v909_v33 = vmul.f32 %v3081_v63, %v3081_v63 }
 0x20f   :  { %v757_v43 = vpop.xlane.xlu1 %756  ;;  %1330 = vperm.xlu1 %1865, %v1080_v4  }
 0x210   :  { %v1901_v19 = vpop.eup %1900  ;;  %v924_v20 = vsub.f32 %v860_v41, %v892_v3  ;;  %v861_v61 = vmul.f32 0.0051020407, %v757_v43 }
 0x211   :  { %v802_v45 = vpop.xlane.xlu0 %801  ;;  %1415 = vperm.xlu0 %1864, %v1097_v23   ;;  %v1082_v28 = vmul.f32 %v1901_v19, %v3086_v22 }
 0x212   :  { %v956_v42 = vmax.f32 %v924_v20, 0.0  ;;  %v925_v31 = vsub.f32 %v861_v61, %v893_v60  ;;  %v876_v48 = vmul.f32 0.0051020407, %v802_v45 }
 0x213   :  { %v805_v38 = vpop.xlane.xlu1 %804  ;;  %v1114_v3 = vmul.f32 %v1082_v28, %v3008_v59  ;;  %1410 = vperm.xlu1 %1865, %v1096_v14   ;;  %v3109_v14 = vld [vmem:[%s3552_s2 + $0x48] sm:$0xff] }
 0x214   :  { %v1903_v10 = vpop.eup %1902  ;;  %v988_v4 = vadd.f32 1e-05, %v956_v42  ;;  %v940_v41 = vsub.f32 %v876_v48, %v908_v30  ;;  %v877_v43 = vmul.f32 0.0051020407, %v805_v38  ;;  %v957_v60 = vmax.f32 %v925_v31, 0.0  ;;  %3666 = vst [vmem:[#allocation59_spill] sm:$0xff] %v3109_v14 }
 0x215   :  { %v600_v19 = vpop.xlane.xlu0 %599  ;;  %1186 = vrot.lane.b32.xlu0 %v1114_v3, %s1957_s23  ;;  %v1098_v20 = vmul.f32 %v1903_v10, %v3097_v46  ;;  %v1905_v59 = vpop.eup %1904  ;;  %v1129_v48 = vmul.f32 %v1097_v23, %v2983_v44 }
 0x216   :  { %1908 = vrsqrt.f32 %v988_v4  ;;  %v972_v61 = vmax.f32 %v940_v41, 0.0  ;;  %v941_v45 = vsub.f32 %v877_v43, %v909_v33  ;;  %v3104_v42 = vmul.f32 0.0051020407, %v600_v19  ;;  %v3134_v4 = vld [vmem:[%s3552_s2 + $0x50] sm:$0xff] }
 0x217   :  { %v603_v47 = vpop.xlane.xlu1 %602  ;;  %v1130_v22 = vmul.f32 %v1098_v20, %v3023_v15  ;;  %1184 = vrot.lane.b32.xlu1 %v1113_v16, %s1957_s23  ;;  %v989_v33 = vadd.f32 1e-05, %v957_v60  ;;  %v1907_v15 = vpop.eup %1906  ;;  %v1083_v38 = vmul.f32 %v1905_v59, %v3109_v14  ;;  %v3124_v16 = vld [vmem:[%s3552_s2 + $0xc8] sm:$0xff]  ;;  %3668 = vst [vmem:[#allocation61_spill] sm:$0xff] %v3134_v4 }
 0x218   :  { %v1004_v0 = vadd.f32 1e-05, %v972_v61  ;;  %v973_v30 = vmax.f32 %v941_v45, 0.0  ;;  %v3113_v13 = vmul.f32 0.0051020407, %v603_v47  ;;  %v894_v3 = vmul.f32 %v3104_v42, %v3104_v42  ;;  %3667 = vst [vmem:[#allocation60_spill] sm:$0xff] %v3124_v16 }
 0x219   :  { %v648_v31 = vpop.xlane.xlu0 %647  ;;  %1218 = vrot.lane.b32.xlu0 %v1130_v22, %s1957_s23  ;;  %v1099_v43 = vmul.f32 %v1907_v15, %v3124_v16  ;;  %v3145_v15 = vld [vmem:[%s3552_s2 + $0xd0] sm:$0xff]  ;;  %v1115_v16 = vmul.f32 %v1083_v38, %v3017_v40 }
 0x21a   :  { %1910 = vrsqrt.f32 %v1004_v0  ;;  %v3119_v10 = vmul.f32 0.0051020407, %v648_v31  ;;  %v1005_v22 = vadd.f32 1e-05, %v973_v30  ;;  %v895_v44 = vmul.f32 %v3113_v13, %v3113_v13 }
 0x21b   :  { %v651_v24 = vpop.xlane.xlu1 %650  ;;  %1216 = vrot.lane.b32.xlu1 %v1129_v48, %s1957_s23  ;;  %1912 = vrsqrt.f32 %v989_v33 }
 0x21c   :  { %v3129_v47 = vmul.f32 0.0051020407, %v651_v24  ;;  %v910_v60 = vmul.f32 %v3119_v10, %v3119_v10  ;;  %1914 = vrsqrt.f32 %v1005_v22 }
 0x21d   :  { %v760_v0 = vpop.xlane.xlu0 %759  ;;  %1345 = vperm.xlu0 %1864, %v1083_v38   ;;  %v1131_v38 = vmul.f32 %v1099_v43, %v3033_v51 }
 0x21e   :  { %v862_v23 = vmul.f32 0.0051020407, %v760_v0  ;;  %v911_v31 = vmul.f32 %v3129_v47, %v3129_v47 }
 0x21f   :  { %v763_v41 = vpop.xlane.xlu1 %762  ;;  %1340 = vperm.xlu1 %1865, %v1082_v28  }
 0x220   :  { %v1909_v19 = vpop.eup %1908  ;;  %v926_v61 = vsub.f32 %v862_v23, %v894_v3  ;;  %v863_v45 = vmul.f32 0.0051020407, %v763_v41 }
 0x221   :  { %v808_v59 = vpop.xlane.xlu0 %807  ;;  %1425 = vperm.xlu0 %1864, %v1099_v43   ;;  %v1084_v30 = vmul.f32 %v1909_v19, %v3134_v4 }
 0x222   :  { %v958_v33 = vmax.f32 %v926_v61, 0.0  ;;  %v927_v24 = vsub.f32 %v863_v45, %v895_v44  ;;  %v878_v48 = vmul.f32 0.0051020407, %v808_v59 }
 0x223   :  { %v811_v0 = vpop.xlane.xlu1 %810  ;;  %v1116_v3 = vmul.f32 %v1084_v30, %v3056_v62  ;;  %1420 = vperm.xlu1 %1865, %v1098_v20   ;;  %v3157_v20 = vld [vmem:[%s3552_s2 + $0x58] sm:$0xff] }
 0x224   :  { %v1911_v22 = vpop.eup %1910  ;;  %v990_v28 = vadd.f32 1e-05, %v958_v33  ;;  %v942_v23 = vsub.f32 %v878_v48, %v910_v60  ;;  %v879_v41 = vmul.f32 0.0051020407, %v811_v0  ;;  %v959_v44 = vmax.f32 %v927_v24, 0.0  ;;  %3669 = vst [vmem:[#allocation62_spill] sm:$0xff] %v3157_v20 }
 0x225   :  { %1190 = vrot.lane.b32.xlu0 %v1116_v3, %s1957_s23  ;;  %v606_v19 = vpop.xlane.xlu0 %605  ;;  %v1100_v61 = vmul.f32 %v1911_v22, %v3145_v15  ;;  %v1913_v62 = vpop.eup %1912 }
 0x226   :  { %1916 = vrsqrt.f32 %v990_v28  ;;  %v974_v45 = vmax.f32 %v942_v23, 0.0  ;;  %v943_v59 = vsub.f32 %v879_v41, %v911_v31  ;;  %v3152_v33 = vmul.f32 0.0051020407, %v606_v19  ;;  %v3182_v28 = vld [vmem:[%s3552_s2 + $0x60] sm:$0xff] }
 0x227   :  { %v609_v14 = vpop.xlane.xlu1 %608  ;;  %v1132_v4 = vmul.f32 %v1100_v61, %v3071_v12  ;;  %1188 = vrot.lane.b32.xlu1 %v1115_v16, %s1957_s23  ;;  %v991_v24 = vadd.f32 1e-05, %v959_v44  ;;  %v1915_v12 = vpop.eup %1914  ;;  %v1085_v0 = vmul.f32 %v1913_v62, %v3157_v20  ;;  %v3172_v16 = vld [vmem:[%s3552_s2 + $0xd8] sm:$0xff]  ;;  %3671 = vst [vmem:[#allocation64_spill] sm:$0xff] %v3182_v28 }
 0x228   :  { %v1006_v46 = vadd.f32 1e-05, %v974_v45  ;;  %v975_v60 = vmax.f32 %v943_v59, 0.0  ;;  %v3161_v40 = vmul.f32 0.0051020407, %v609_v14  ;;  %v896_v3 = vmul.f32 %v3152_v33, %v3152_v33  ;;  %3670 = vst [vmem:[#allocation63_spill] sm:$0xff] %v3172_v16 }
 0x229   :  { %1222 = vrot.lane.b32.xlu0 %v1132_v4, %s1957_s23  ;;  %v654_v31 = vpop.xlane.xlu0 %653  ;;  %v1101_v41 = vmul.f32 %v1915_v12, %v3172_v16  ;;  %v3193_v12 = vld [vmem:[%s3552_s2 + $0xe0] sm:$0xff] }
 0x22a   :  { %1918 = vrsqrt.f32 %v1006_v46  ;;  %v3167_v22 = vmul.f32 0.0051020407, %v654_v31  ;;  %v1007_v4 = vadd.f32 1e-05, %v975_v60  ;;  %v897_v51 = vmul.f32 %v3161_v40, %v3161_v40 }
 0x22b   :  { %v657_v48 = vpop.xlane.xlu1 %656  ;;  %1220 = vrot.lane.b32.xlu1 %v1131_v38, %s1957_s23  ;;  %1920 = vrsqrt.f32 %v991_v24 }
 0x22c   :  { %v3177_v14 = vmul.f32 0.0051020407, %v657_v48  ;;  %v912_v44 = vmul.f32 %v3167_v22, %v3167_v22  ;;  %1922 = vrsqrt.f32 %v1007_v4 }
 0x22d   :  { %1355 = vperm.xlu0 %1864, %v1085_v0   ;;  %v766_v46 = vpop.xlane.xlu0 %765 }
 0x22e   :  { %v864_v43 = vmul.f32 0.0051020407, %v766_v46  ;;  %v913_v31 = vmul.f32 %v3177_v14, %v3177_v14 }
 0x22f   :  { %v769_v23 = vpop.xlane.xlu1 %768  ;;  %1350 = vperm.xlu1 %1865, %v1084_v30  }
 0x230   :  { %v1917_v19 = vpop.eup %1916  ;;  %v928_v45 = vsub.f32 %v864_v43, %v896_v3  ;;  %v865_v59 = vmul.f32 0.0051020407, %v769_v23 }
 0x231   :  { %1435 = vperm.xlu0 %1864, %v1101_v41   ;;  %v814_v62 = vpop.xlane.xlu0 %813  ;;  %v1086_v60 = vmul.f32 %v1917_v19, %v3182_v28 }
 0x232   :  { %v960_v24 = vmax.f32 %v928_v45, 0.0  ;;  %v929_v38 = vsub.f32 %v865_v59, %v897_v51  ;;  %v880_v48 = vmul.f32 0.0051020407, %v814_v62  ;;  %v1117_v62 = vmul.f32 %v1085_v0, %v3065_v27 }
 0x233   :  { %v817_v46 = vpop.xlane.xlu1 %816  ;;  %v1118_v3 = vmul.f32 %v1086_v60, %v3104_v42  ;;  %1430 = vperm.xlu1 %1865, %v1100_v61   ;;  %v3203_v42 = vld [vmem:[%s3552_s2 + $0x68] sm:$0xff] }
 0x234   :  { %v1919_v4 = vpop.eup %1918  ;;  %v992_v30 = vadd.f32 1e-05, %v960_v24  ;;  %v944_v43 = vsub.f32 %v880_v48, %v912_v44  ;;  %v881_v23 = vmul.f32 0.0051020407, %v817_v46  ;;  %v961_v51 = vmax.f32 %v929_v38, 0.0 }
 0x235   :  { %1194 = vrot.lane.b32.xlu0 %v1118_v3, %s1957_s23  ;;  %v1102_v19 = vmul.f32 %v1919_v4, %v3193_v12  ;;  %v1921_v20 = vpop.eup %1920 }
 0x236   :  { %1924 = vrsqrt.f32 %v992_v30  ;;  %v976_v45 = vmax.f32 %v944_v43, 0.0  ;;  %v945_v59 = vsub.f32 %v881_v23, %v913_v31  ;;  %v993_v61 = vadd.f32 1e-05, %v961_v51  ;;  %v1923_v24 = vpop.eup %1922  ;;  %v3235_v30 = vld [vmem:[%s3552_s2 + $0x78] sm:$0xff] }
 0x237   :  { %v1134_v16 = vmul.f32 %v1102_v19, %v3119_v10  ;;  %1192 = vrot.lane.b32.xlu1 %v1117_v62, %s1957_s23  ;;  %v1133_v31 = vmul.f32 %v1101_v41, %v3081_v63  ;;  %v1087_v27 = vmul.f32 %v1921_v20, %v3203_v42  ;;  %v3212_v10 = vld [vmem:[%s3552_s2 + $0xe8] sm:$0xff]  ;;  %v3225_v41 = vld [vmem:[%s3552_s2 + $0xf0] sm:$0xff] }
 0x238   :  { %v1008_v28 = vadd.f32 1e-05, %v976_v45  ;;  %v977_v44 = vmax.f32 %v945_v59, 0.0 }
 0x239   :  { %1226 = vrot.lane.b32.xlu0 %v1134_v16, %s1957_s23  ;;  %v3218_v16 = vld [vmem:[%s3552_s2 + $0x70] sm:$0xff]  ;;  %v1119_v3 = vmul.f32 %v1087_v27, %v3113_v13  ;;  %v3244_v13 = vld [vmem:[%s3552_s2 + $0xf8] sm:$0xff]  ;;  %s1959_s2 = smov [#allocation3]  }
 0x23a   :  { %1926 = vrsqrt.f32 %v1008_v28  ;;  %v1009_v0 = vadd.f32 1e-05, %v977_v44  ;;  %v1103_v28 = vmul.f32 %v1923_v24, %v3212_v10 }
 0x23b   :  { %1224 = vrot.lane.b32.xlu1 %v1133_v31, %s1957_s23  ;;  %1928 = vrsqrt.f32 %v993_v61 }
 0x23c   :  { %1930 = vrsqrt.f32 %v1009_v0 }
 0x23d   :  { %1365 = vperm.xlu0 %1864, %v1087_v27  }
 0x23f   :  { %1360 = vperm.xlu1 %1865, %v1086_v60  }
 0x240   :  { %v1925_v63 = vpop.eup %1924 }
 0x241   :  { %1445 = vperm.xlu0 %1864, %v1103_v28   ;;  %v1088_v20 = vmul.f32 %v1925_v63, %v3218_v16 }
 0x243   :  { %v1120_v38 = vmul.f32 %v1088_v20, %v3152_v33  ;;  %1440 = vperm.xlu1 %1865, %v1102_v19   ;;  %v1135_v33 = vmul.f32 %v1103_v28, %v3129_v47  ;;  %v1958_v19 = vmov 1  }
 0x244   :  { %v1927_v48 = vpop.eup %1926 }
 0x245   :  { %1198 = vrot.lane.b32.xlu0 %v1120_v38, %s1957_s23  ;;  %v1104_v46 = vmul.f32 %v1927_v48, %v3225_v41  ;;  %v1929_v4 = vpop.eup %1928 }
 0x246   :  { %v1089_v43 = vmul.f32 %v1929_v4, %v3235_v30  ;;  %v1931_v23 = vpop.eup %1930 }
 0x247   :  { %v1136_v60 = vmul.f32 %v1104_v46, %v3167_v22  ;;  %1196 = vrot.lane.b32.xlu1 %v1119_v3, %s1957_s23  ;;  %v1105_v22 = vmul.f32 %v1931_v23, %v3244_v13 }
 0x248   :  { %v1121_v59 = vmul.f32 %v1089_v43, %v3161_v40 }
 0x249   :  { %1230 = vrot.lane.b32.xlu0 %v1136_v60, %s1957_s23  ;;  %v1137_v61 = vmul.f32 %v1105_v22, %v3177_v14 }
 0x24b   :  { %1228 = vrot.lane.b32.xlu1 %v1135_v33, %s1957_s23 }
 0x24d   :  { %1375 = vperm.xlu0 %1864, %v1089_v43  }
 0x24f   :  { %1370 = vperm.xlu1 %1865, %v1088_v20  }
 0x251   :  { %1455 = vperm.xlu0 %1864, %v1105_v22  }
 0x253   :  { %1450 = vperm.xlu1 %1865, %v1104_v46  }
 0x255   :  { %1867 = vset.pattern.permute.xlu0 %v1958_v19 }
 0x256   :  { %v1301_v51 = vpop.permute.xlu0 %1300 }
 0x257   :  { %v3249_v47 = vmul.f32 %v1301_v51, %v2446_v21  ;;  %v3252_v45 = vmul.f32 %v1301_v51, %v2450_v25  ;;  %1200 = vrot.lane.b32.xlu1 %v1121_v59, %s1957_s23  ;;  %v3672_v59 = vld [vmem:[#allocation8_spill] sm:$0xff] }
 0x258   :  { %1866 = vset.pattern.permute.xlu1 %v1958_v19 }
 0x25a   :  { %v1171_v62 = vpop.permute.xlu0 %1170  ;;  %v3257_v44 = vpop.permute.xlu1 %1380 }
 0x25b   :  { %1232 = vrot.lane.b32.xlu1 %v1137_v61, %s1957_s23  ;;  %v1266_v31 = vsub.f32 %v2903_v6, %v1171_v62  ;;  %v3674_v61 = vld [vmem:[#allocation12_spill] sm:$0xff]  ;;  %s1815_s23 = sshll.u32 %s1959_s2, 4  ;;  %s1816_s23 = int_to_ptr.vmem [resolvable:$true] %s1815_s23 }
 0x25c   :  { %s1932_s28 = scalar_lea.vmem %s1816_s23, 8192  ;;  %p1937_p1 = scmp.lt.s32.totalorder %s1816_s23, %s1816_s23 }
 0x25d   :  { %p1933_p0 = scmp.ne.s32.totalorder %s1816_s23, %s1932_s28  ;;  %p1938_p2 = scmp.lt.s32.totalorder %s1932_s28, %s1932_s28 }
 0x25e   :  { %v1203_v24 = vpop.permute.xlu0 %1202  ;;  %v1306_v27 = vpop.permute.xlu1 %1305 }
 0x25f   :  { %v1282_v21 = vsub.f32 %v2911_v58, %v1203_v24  ;;  %v3263_v25 = vmul.f32 %v1306_v27, %v2458_v29  ;;  %v3266_v40 = vmul.f32 %v1306_v27, %v2470_v36  ;;  %1524 = vperm.xlu1 %1866, %v1266_v31   ;;  %v3675_v31 = vld [vmem:[#allocation13_spill] sm:$0xff]  ;;  %p1939_p3 = por %p1938_p2, %p1937_p1 }
 0x260   :  { %v3676_v27 = vld [vmem:[#allocation9_spill] sm:$0xff] }
 0x261   :  { %1604 = vperm.xlu0 %1867, %v1282_v21   ;;  %p1940_p4 = pnand %p1939_p3, %p1933_p0 }
 0x262   :  { %v1386_v0 = vpop.permute.xlu0 %1385  ;;  %v1173_v63 = vpop.permute.xlu1 %1172 }
 0x263   :  { %v3269_v14 = vmul.f32 %v1386_v0, %v2460_v32  ;;  %v3272_v28 = vmul.f32 %v1386_v0, %v2472_v37  ;;  %v1267_v6 = vsub.f32 %v2921_v55, %v1173_v63  ;;  %v3677_v0 = vld [vmem:[#allocation11_spill] sm:$0xff] }
 0x265   :  { %1529 = vperm.xlu0 %1867, %v1267_v6  }
 0x266   :  { %v1207_v58 = vpop.permute.xlu0 %1206  ;;  %v1205_v20 = vpop.permute.xlu1 %1204 }
 0x267   :  { %v1284_v29 = vsub.f32 %v2947_v35, %v1207_v58  ;;  %v1283_v36 = vsub.f32 %v2935_v39, %v1205_v20 }
 0x269   :  { %1614 = vperm.xlu0 %1867, %v1284_v29   ;;  %1609 = vperm.xlu1 %1866, %v1283_v36  }
 0x26a   :  { %v1311_v38 = vpop.permute.xlu1 %1310 }
 0x26b   :  { %v3278_v32 = vmul.f32 %v1311_v38, %v2486_v49  ;;  %v3281_v37 = vmul.f32 %v1311_v38, %v2490_v53 }
 0x26c   :  { %v1316_v48 = vpop.permute.xlu0 %1315 }
 0x26d   :  { %v3284_v46 = vmul.f32 %v1316_v48, %v2500_v1  ;;  %v3287_v55 = vmul.f32 %v1316_v48, %v2510_v52 }
 0x26e   :  { %v1391_v35 = vpop.permute.xlu1 %1390 }
 0x26f   :  { %v3290_v39 = vmul.f32 %v1391_v35, %v2488_v50  ;;  %v3293_v60 = vmul.f32 %v1391_v35, %v2492_v54  ;;  %v3678_v35 = vld [vmem:[#allocation54_spill] sm:$0xff] }
 0x270   :  { %v1396_v3 = vpop.permute.xlu0 %1395 }
 0x271   :  { %v3296_v49 = vmul.f32 %v1396_v3, %v2502_v8  ;;  %v3299_v53 = vmul.f32 %v1396_v3, %v2512_v57 }
 0x272   :  { %v1175_v4 = vpop.permute.xlu1 %1174 }
 0x273   :  { %v1268_v33 = vsub.f32 %v2959_v7, %v1175_v4  ;;  %v3679_v4 = vld [vmem:[#allocation18_spill] sm:$0xff] }
 0x274   :  { %v1179_v1 = vpop.permute.xlu0 %1178 }
 0x275   :  { %v1270_v52 = vsub.f32 %v2988_v2, %v1179_v1  ;;  %1534 = vperm.xlu1 %1866, %v1268_v33   ;;  %v3680_v33 = vld [vmem:[#allocation20_spill] sm:$0xff] }
 0x276   :  { %v1177_v43 = vpop.permute.xlu1 %1176 }
 0x277   :  { %1544 = vperm.xlu0 %1867, %v1270_v52   ;;  %v1269_v23 = vsub.f32 %v2964_v5, %v1177_v43  ;;  %v3673_v5 = vld [vmem:[#allocation10_spill] sm:$0xff] }
 0x278   :  { %v1211_v50 = vpop.permute.xlu0 %1210 }
 0x279   :  { %v1286_v54 = vsub.f32 %v2999_v18, %v1211_v50  ;;  %1539 = vperm.xlu1 %1866, %v1269_v23   ;;  %v3681_v50 = vld [vmem:[#allocation14_spill] sm:$0xff] }
 0x27a   :  { %v1209_v8 = vpop.permute.xlu1 %1208 }
 0x27b   :  { %1624 = vperm.xlu0 %1867, %v1286_v54   ;;  %v1285_v57 = vsub.f32 %v2979_v56, %v1209_v8  ;;  %v3683_v54 = vld [vmem:[#allocation19_spill] sm:$0xff] }
 0x27c   :  { %v1326_v22 = vpop.permute.xlu0 %1325 }
 0x27d   :  { %v3307_v19 = vmul.f32 %v1326_v22, %v2540_v11  ;;  %v3310_v7 = vmul.f32 %v1326_v22, %v2556_v17  ;;  %1619 = vperm.xlu1 %1866, %v1285_v57   ;;  %v3684_v22 = vld [vmem:[#allocation21_spill] sm:$0xff] }
 0x27e   :  { %v1321_v2 = vpop.permute.xlu1 %1320 }
 0x27f   :  { %v3313_v62 = vmul.f32 %v1321_v2, %v3672_v59  ;;  %v3316_v18 = vmul.f32 %v1321_v2, %v3673_v5  ;;  %v3685_v59 = vld [vmem:[#allocation15_spill] sm:$0xff] }
 0x280   :  { %v1406_v51 = vpop.permute.xlu0 %1405 }
 0x281   :  { %v3319_v24 = vmul.f32 %v1406_v51, %v3674_v61  ;;  %v3322_v56 = vmul.f32 %v1406_v51, %v3675_v31  ;;  %v3686_v61 = vld [vmem:[#allocation17_spill] sm:$0xff] }
 0x282   :  { %v1401_v11 = vpop.permute.xlu1 %1400 }
 0x283   :  { %v3325_v17 = vmul.f32 %v1401_v11, %v3676_v27  ;;  %v3328_v63 = vmul.f32 %v1401_v11, %v3677_v0  ;;  %v3687_v11 = vld [vmem:[#allocation57_spill] sm:$0xff] }
 0x284   :  { %v1183_v21 = vpop.permute.xlu0 %1182 }
 0x285   :  { %v1272_v6 = vsub.f32 %v3038_v34, %v1183_v21 }
 0x286   :  { %v1181_v58 = vpop.permute.xlu1 %1180 }
 0x287   :  { %1554 = vperm.xlu0 %1867, %v1272_v6   ;;  %v1271_v20 = vsub.f32 %v3013_v26, %v1181_v58  ;;  %v3682_v26 = vld [vmem:[#allocation16_spill] sm:$0xff]  ;;  %v3688_v6 = vld [vmem:[#allocation55_spill] sm:$0xff] }
 0x288   :  { %v1215_v29 = vpop.permute.xlu0 %1214 }
 0x289   :  { %v1288_v36 = vsub.f32 %v3049_v9, %v1215_v29  ;;  %1549 = vperm.xlu1 %1866, %v1271_v20   ;;  %v3689_v29 = vld [vmem:[#allocation58_spill] sm:$0xff] }
 0x28a   :  { %v1213_v38 = vpop.permute.xlu1 %1212 }
 0x28b   :  { %1634 = vperm.xlu0 %1867, %v1288_v36   ;;  %v1287_v3 = vsub.f32 %v3678_v35, %v1213_v38 }
 0x28c   :  { %v1336_v48 = vpop.permute.xlu0 %1335 }
 0x28d   :  { %v3335_v1 = vmul.f32 %v1336_v48, %v3679_v4  ;;  %v3338_v52 = vmul.f32 %v1336_v48, %v3680_v33  ;;  %1629 = vperm.xlu1 %1866, %v1287_v3   ;;  %v3690_v48 = vld [vmem:[#allocation56_spill] sm:$0xff]  ;;  %v3691_v3 = vld [vmem:[#allocation26_spill] sm:$0xff] }
 0x28e   :  { %v1331_v34 = vpop.permute.xlu1 %1330  ;;  %v3692_v33 = vld [vmem:[#allocation28_spill] sm:$0xff] }
 0x28f   :  { %v3341_v23 = vmul.f32 %v1331_v34, %v3681_v50  ;;  %v3344_v9 = vmul.f32 %v1331_v34, %v3682_v26  ;;  %v3693_v26 = vld [vmem:[#allocation22_spill] sm:$0xff] }
 0x290   :  { %v1416_v43 = vpop.permute.xlu0 %1415 }
 0x291   :  { %v3347_v8 = vmul.f32 %v1416_v43, %v3683_v54  ;;  %v3350_v57 = vmul.f32 %v1416_v43, %v3684_v22  ;;  %v3694_v22 = vld [vmem:[#allocation24_spill] sm:$0xff] }
 0x292   :  { %v1411_v2 = vpop.permute.xlu1 %1410 }
 0x293   :  { %v3353_v5 = vmul.f32 %v1411_v2, %v3685_v59  ;;  %v3356_v31 = vmul.f32 %v1411_v2, %v3686_v61  ;;  %v3697_v61 = vld [vmem:[#allocation29_spill] sm:$0xff] }
 0x294   :  { %v1187_v51 = vpop.permute.xlu0 %1186 }
 0x295   :  { %v1274_v21 = vsub.f32 %v3687_v11, %v1187_v51  ;;  %v3695_v51 = vld [vmem:[#allocation27_spill] sm:$0xff] }
 0x296   :  { %v1185_v27 = vpop.permute.xlu1 %1184 }
 0x297   :  { %1564 = vperm.xlu0 %1867, %v1274_v21   ;;  %v1273_v58 = vsub.f32 %v3688_v6, %v1185_v27 }
 0x298   :  { %v1219_v0 = vpop.permute.xlu0 %1218 }
 0x299   :  { %v1290_v20 = vsub.f32 %v3689_v29, %v1219_v0  ;;  %1559 = vperm.xlu1 %1866, %v1273_v58   ;;  %v3699_v0 = vld [vmem:[#allocation23_spill] sm:$0xff]  ;;  %v3700_v58 = vld [vmem:[#allocation25_spill] sm:$0xff] }
 0x29a   :  { %v1217_v36 = vpop.permute.xlu1 %1216 }
 0x29b   :  { %1644 = vperm.xlu0 %1867, %v1290_v20   ;;  %v1289_v35 = vsub.f32 %v3690_v48, %v1217_v36  ;;  %v3701_v20 = vld [vmem:[#allocation61_spill] sm:$0xff] }
 0x29c   :  { %v1346_v38 = vpop.permute.xlu0 %1345 }
 0x29d   :  { %v3363_v4 = vmul.f32 %v1346_v38, %v3691_v3  ;;  %v3366_v34 = vmul.f32 %v1346_v38, %v3692_v33  ;;  %1639 = vperm.xlu1 %1866, %v1289_v35   ;;  %v3702_v35 = vld [vmem:[#allocation59_spill] sm:$0xff] }
 0x29e   :  { %v1341_v43 = vpop.permute.xlu1 %1340 }
 0x29f   :  { %v3369_v54 = vmul.f32 %v1341_v43, %v3693_v26  ;;  %v3372_v2 = vmul.f32 %v1341_v43, %v3694_v22  ;;  %v3703_v26 = vld [vmem:[#allocation60_spill] sm:$0xff] }
 0x2a0   :  { %v1426_v50 = vpop.permute.xlu0 %1425 }
 0x2a1   :  { %v3375_v59 = vmul.f32 %v1426_v50, %v3695_v51  ;;  %v3378_v11 = vmul.f32 %v1426_v50, %v3697_v61  ;;  %v3704_v51 = vld [vmem:[#allocation34_spill] sm:$0xff] }
 0x2a2   :  { %v1421_v21 = vpop.permute.xlu1 %1420 }
 0x2a3   :  { %3696 = vst [vmem:[#allocation8_spill] sm:$0xff] %v3375_v59  ;;  %3698 = vst [vmem:[#allocation10_spill] sm:$0xff] %v3378_v11  ;;  %v3381_v6 = vmul.f32 %v1421_v21, %v3699_v0  ;;  %v3384_v29 = vmul.f32 %v1421_v21, %v3700_v58  ;;  %v3706_v21 = vld [vmem:[#allocation36_spill] sm:$0xff] }
 0x2a4   :  { %v1191_v27 = vpop.permute.xlu0 %1190 }
 0x2a5   :  { %v1276_v36 = vsub.f32 %v3701_v20, %v1191_v27  ;;  %v3708_v20 = vld [vmem:[#allocation30_spill] sm:$0xff] }
 0x2a6   :  { %v1189_v38 = vpop.permute.xlu1 %1188 }
 0x2a7   :  { %1574 = vperm.xlu0 %1867, %v1276_v36   ;;  %v1275_v3 = vsub.f32 %v3702_v35, %v1189_v38  ;;  %v3709_v38 = vld [vmem:[#allocation32_spill] sm:$0xff] }
 0x2a8   :  { %v1223_v48 = vpop.permute.xlu0 %1222 }
 0x2a9   :  { %v1292_v33 = vsub.f32 %v3145_v15, %v1223_v48  ;;  %1569 = vperm.xlu1 %1866, %v1275_v3   ;;  %v3710_v48 = vld [vmem:[#allocation35_spill] sm:$0xff]  ;;  %v3712_v3 = vld [vmem:[#allocation37_spill] sm:$0xff] }
 0x2aa   :  { %v1221_v43 = vpop.permute.xlu1 %1220 }
 0x2ab   :  { %1654 = vperm.xlu0 %1867, %v1292_v33   ;;  %v1291_v22 = vsub.f32 %v3703_v26, %v1221_v43 }
 0x2ac   :  { %v1356_v50 = vpop.permute.xlu0 %1355 }
 0x2ad   :  { %v3391_v61 = vmul.f32 %v1356_v50, %v3704_v51  ;;  %v3394_v0 = vmul.f32 %v1356_v50, %v3706_v21  ;;  %1649 = vperm.xlu1 %1866, %v1291_v22   ;;  %v3714_v51 = vld [vmem:[#allocation31_spill] sm:$0xff]  ;;  %v3715_v22 = vld [vmem:[#allocation33_spill] sm:$0xff] }
 0x2ae   :  { %v1351_v27 = vpop.permute.xlu1 %1350 }
 0x2af   :  { %3705 = vst [vmem:[#allocation12_spill] sm:$0xff] %v3391_v61  ;;  %3707 = vst [vmem:[#allocation13_spill] sm:$0xff] %v3394_v0  ;;  %v3397_v36 = vmul.f32 %v1351_v27, %v3708_v20  ;;  %v3400_v15 = vmul.f32 %v1351_v27, %v3709_v38  ;;  %v3717_v0 = vld [vmem:[#allocation64_spill] sm:$0xff]  ;;  %v3718_v38 = vld [vmem:[#allocation62_spill] sm:$0xff] }
 0x2b0   :  { %v1436_v58 = vpop.permute.xlu0 %1435 }
 0x2b1   :  { %v3403_v35 = vmul.f32 %v1436_v58, %v3710_v48  ;;  %v3406_v33 = vmul.f32 %v1436_v58, %v3712_v3 }
 0x2b2   :  { %v1431_v43 = vpop.permute.xlu1 %1430 }
 0x2b3   :  { %3711 = vst [vmem:[#allocation9_spill] sm:$0xff] %v3403_v35  ;;  %3713 = vst [vmem:[#allocation11_spill] sm:$0xff] %v3406_v33  ;;  %v3409_v50 = vmul.f32 %v1431_v43, %v3714_v51  ;;  %v3412_v21 = vmul.f32 %v1431_v43, %v3715_v22  ;;  %v3719_v33 = vld [vmem:[#allocation63_spill] sm:$0xff]  ;;  %v3720_v51 = vld [vmem:[#allocation42_spill] sm:$0xff] }
 0x2b4   :  { %v1195_v26 = vpop.permute.xlu0 %1194  ;;  %v3722_v43 = vld [vmem:[#allocation44_spill] sm:$0xff] }
 0x2b5   :  { %3716 = vst [vmem:[#allocation54_spill] sm:$0xff] %v3412_v21  ;;  %v1278_v20 = vsub.f32 %v3717_v0, %v1195_v26 }
 0x2b6   :  { %v1193_v61 = vpop.permute.xlu1 %1192 }
 0x2b7   :  { %1584 = vperm.xlu0 %1867, %v1278_v20   ;;  %v1277_v11 = vsub.f32 %v3718_v38, %v1193_v61  ;;  %v3724_v20 = vld [vmem:[#allocation38_spill] sm:$0xff]  ;;  %v3725_v61 = vld [vmem:[#allocation40_spill] sm:$0xff]  ;;  %v3728_v38 = vld [vmem:[#allocation45_spill] sm:$0xff] }
 0x2b8   :  { %v1227_v27 = vpop.permute.xlu0 %1226 }
 0x2b9   :  { %v1294_v48 = vsub.f32 %v3193_v12, %v1227_v27  ;;  %1579 = vperm.xlu1 %1866, %v1277_v11   ;;  %v3726_v11 = vld [vmem:[#allocation43_spill] sm:$0xff] }
 0x2ba   :  { %v1225_v58 = vpop.permute.xlu1 %1224 }
 0x2bb   :  { %1664 = vperm.xlu0 %1867, %v1294_v48   ;;  %v1293_v35 = vsub.f32 %v3719_v33, %v1225_v58 }
 0x2bc   :  { %v1366_v3 = vpop.permute.xlu0 %1365 }
 0x2bd   :  { %v3419_v59 = vmul.f32 %v1366_v3, %v3720_v51  ;;  %v3422_v22 = vmul.f32 %v1366_v3, %v3722_v43  ;;  %1659 = vperm.xlu1 %1866, %v1293_v35   ;;  %v3730_v51 = vld [vmem:[#allocation39_spill] sm:$0xff]  ;;  %v3731_v35 = vld [vmem:[#allocation41_spill] sm:$0xff] }
 0x2be   :  { %v1361_v0 = vpop.permute.xlu1 %1360 }
 0x2bf   :  { %3721 = vst [vmem:[#allocation18_spill] sm:$0xff] %v3419_v59  ;;  %3723 = vst [vmem:[#allocation20_spill] sm:$0xff] %v3422_v22  ;;  %v3425_v21 = vmul.f32 %v1361_v0, %v3724_v20  ;;  %v3428_v12 = vmul.f32 %v1361_v0, %v3725_v61 }
 0x2c0   :  { %v1446_v26 = vpop.permute.xlu0 %1445 }
 0x2c1   :  { %v3431_v27 = vmul.f32 %v1446_v26, %v3726_v11  ;;  %v3434_v33 = vmul.f32 %v1446_v26, %v3728_v38 }
 0x2c2   :  { %v1441_v48 = vpop.permute.xlu1 %1440 }
 0x2c3   :  { %3727 = vst [vmem:[#allocation14_spill] sm:$0xff] %v3431_v27  ;;  %3729 = vst [vmem:[#allocation16_spill] sm:$0xff] %v3434_v33  ;;  %v3437_v3 = vmul.f32 %v1441_v48, %v3730_v51  ;;  %v3440_v43 = vmul.f32 %v1441_v48, %v3731_v35  ;;  %v3732_v51 = vld [vmem:[#allocation50_spill] sm:$0xff]  ;;  %v3734_v48 = vld [vmem:[#allocation52_spill] sm:$0xff] }
 0x2c4   :  { %v1199_v58 = vpop.permute.xlu0 %1198 }
 0x2c5   :  { %v1280_v20 = vsub.f32 %v3218_v16, %v1199_v58 }
 0x2c6   :  { %v1197_v22 = vpop.permute.xlu1 %1196 }
 0x2c7   :  { %1594 = vperm.xlu0 %1867, %v1280_v20   ;;  %v1279_v61 = vsub.f32 %v3203_v42, %v1197_v22  ;;  %v3736_v20 = vld [vmem:[#allocation46_spill] sm:$0xff]  ;;  %v3737_v42 = vld [vmem:[#allocation48_spill] sm:$0xff]  ;;  %v3738_v22 = vld [vmem:[#allocation51_spill] sm:$0xff] }
 0x2c8   :  { %v1231_v0 = vpop.permute.xlu0 %1230 }
 0x2c9   :  { %v1296_v11 = vsub.f32 %v3225_v41, %v1231_v0  ;;  %1589 = vperm.xlu1 %1866, %v1279_v61   ;;  %v3740_v61 = vld [vmem:[#allocation53_spill] sm:$0xff] }
 0x2ca   :  { %v1229_v26 = vpop.permute.xlu1 %1228 }
 0x2cb   :  { %1674 = vperm.xlu0 %1867, %v1296_v11   ;;  %v1295_v33 = vsub.f32 %v3212_v10, %v1229_v26  ;;  %v3742_v26 = vld [vmem:[#allocation47_spill] sm:$0xff] }
 0x2cc   :  { %v1376_v38 = vpop.permute.xlu0 %1375 }
 0x2cd   :  { %v3447_v27 = vmul.f32 %v1376_v38, %v3732_v51  ;;  %v3450_v35 = vmul.f32 %v1376_v38, %v3734_v48  ;;  %1669 = vperm.xlu1 %1866, %v1295_v33   ;;  %v3743_v38 = vld [vmem:[#allocation49_spill] sm:$0xff] }
 0x2ce   :  { %v1371_v16 = vpop.permute.xlu1 %1370 }
 0x2cf   :  { %3733 = vst [vmem:[#allocation19_spill] sm:$0xff] %v3447_v27  ;;  %3735 = vst [vmem:[#allocation21_spill] sm:$0xff] %v3450_v35  ;;  %v3453_v59 = vmul.f32 %v1371_v16, %v3736_v20  ;;  %v3456_v41 = vmul.f32 %v1371_v16, %v3737_v42  ;;  %v3744_v42 = vld [vmem:[#allocation6_spill] sm:$0xff] }
 0x2d0   :  { %v1456_v58 = vpop.permute.xlu0 %1455 }
 0x2d1   :  { %v3459_v0 = vmul.f32 %v1456_v58, %v3738_v22  ;;  %v3462_v10 = vmul.f32 %v1456_v58, %v3740_v61  ;;  %v1490_v22 = vmul.f32 %v3257_v44, %v3744_v42 }
 0x2d2   :  { %v1451_v11 = vpop.permute.xlu1 %1450 }
 0x2d3   :  { %3739 = vst [vmem:[#allocation15_spill] sm:$0xff] %v3459_v0  ;;  %3741 = vst [vmem:[#allocation17_spill] sm:$0xff] %v3462_v10  ;;  %v3465_v51 = vmul.f32 %v1451_v11, %v3742_v26  ;;  %v3468_v33 = vmul.f32 %v1451_v11, %v3743_v38  ;;  %v3745_v0 = vld [vmem:[#allocation7_spill] sm:$0xff] }
 0x2d4   :  { %v1491_v58 = vmul.f32 %v3257_v44, %v3745_v0 }
 0x2d6   :  { %v1201_v48 = vpop.permute.xlu1 %1200 }
 0x2d7   :  { %v1281_v20 = vsub.f32 %v3235_v30, %v1201_v48 }
 0x2d9   :  { %1599 = vperm.xlu1 %1866, %v1281_v20  }
 0x2da   :  { %v1233_v35 = vpop.permute.xlu1 %1232 }
 0x2db   :  { %v1297_v16 = vsub.f32 %v3244_v13, %v1233_v35 }
 0x2dd   :  { %1679 = vperm.xlu1 %1866, %v1297_v16  }
 0x2de   :  { %v1525_v61 = vpop.permute.xlu1 %1524 }
 0x2df   :  { %v1682_v10 = vadd.f32 %v1525_v61, %v3249_v47  ;;  %v1683_v11 = vadd.f32 %v1525_v61, %v3252_v45 }
 0x2e0   :  { %v1605_v26 = vpop.permute.xlu0 %1604 }
 0x2e1   :  { %v1714_v38 = vadd.f32 %v1605_v26, %v1490_v22  ;;  %v1715_v27 = vadd.f32 %v1605_v26, %v1491_v58  ;;  %1746 = vst [vmem:[#allocation3] sm:$0xff] %v1682_v10  ;;  %1747 = vst [vmem:[#allocation3 + $0x8] sm:$0xff] %v1683_v11 }
 0x2e3   :  { %1778 = vst [vmem:[#allocation3 + $0x100] sm:$0xff] %v1714_v38  ;;  %1779 = vst [vmem:[#allocation3 + $0x108] sm:$0xff] %v1715_v27 }
 0x2e4   :  { %v1530_v30 = vpop.permute.xlu0 %1529 }
 0x2e5   :  { %v1684_v13 = vadd.f32 %v1530_v30, %v3263_v25  ;;  %v1685_v35 = vadd.f32 %v1530_v30, %v3266_v40 }
 0x2e7   :  { %1748 = vst [vmem:[#allocation3 + $0x10] sm:$0xff] %v1684_v13  ;;  %1749 = vst [vmem:[#allocation3 + $0x18] sm:$0xff] %v1685_v35 }
 0x2e8   :  { %v1615_v44 = vpop.permute.xlu0 %1614  ;;  %v1610_v0 = vpop.permute.xlu1 %1609 }
 0x2e9   :  { %v1718_v48 = vadd.f32 %v1615_v44, %v3290_v39  ;;  %v1719_v47 = vadd.f32 %v1615_v44, %v3293_v60  ;;  %v1716_v45 = vadd.f32 %v1610_v0, %v3269_v14  ;;  %v1717_v10 = vadd.f32 %v1610_v0, %v3272_v28 }
 0x2eb   :  { %1782 = vst [vmem:[#allocation3 + $0x120] sm:$0xff] %v1718_v48  ;;  %1783 = vst [vmem:[#allocation3 + $0x128] sm:$0xff] %v1719_v47 }
 0x2ec   :  { %1780 = vst [vmem:[#allocation3 + $0x110] sm:$0xff] %v1716_v45  ;;  %1781 = vst [vmem:[#allocation3 + $0x118] sm:$0xff] %v1717_v10 }
 0x2f4   :  { %v1535_v27 = vpop.permute.xlu1 %1534 }
 0x2f5   :  { %v1686_v40 = vadd.f32 %v1535_v27, %v3278_v32  ;;  %v1687_v20 = vadd.f32 %v1535_v27, %v3281_v37 }
 0x2f6   :  { %v1545_v25 = vpop.permute.xlu0 %1544 }
 0x2f7   :  { %v1690_v16 = vadd.f32 %v1545_v25, %v3313_v62  ;;  %v1691_v39 = vadd.f32 %v1545_v25, %v3316_v18  ;;  %1750 = vst [vmem:[#allocation3 + $0x20] sm:$0xff] %v1686_v40  ;;  %1751 = vst [vmem:[#allocation3 + $0x28] sm:$0xff] %v1687_v20  ;;  %v3749_v20 = vld [vmem:[#allocation12_spill] sm:$0xff] }
 0x2f8   :  { %v1540_v14 = vpop.permute.xlu1 %1539 }
 0x2f9   :  { %1754 = vst [vmem:[#allocation3 + $0x40] sm:$0xff] %v1690_v16  ;;  %1755 = vst [vmem:[#allocation3 + $0x48] sm:$0xff] %v1691_v39  ;;  %v1688_v60 = vadd.f32 %v1540_v14, %v3284_v46  ;;  %v1689_v42 = vadd.f32 %v1540_v14, %v3287_v55  ;;  %v3750_v39 = vld [vmem:[#allocation13_spill] sm:$0xff] }
 0x2fa   :  { %v1625_v28 = vpop.permute.xlu0 %1624 }
 0x2fb   :  { %v1722_v22 = vadd.f32 %v1625_v28, %v3325_v17  ;;  %v1723_v32 = vadd.f32 %v1625_v28, %v3328_v63  ;;  %1752 = vst [vmem:[#allocation3 + $0x30] sm:$0xff] %v1688_v60  ;;  %1753 = vst [vmem:[#allocation3 + $0x38] sm:$0xff] %v1689_v42 }
 0x2fc   :  { %v1620_v37 = vpop.permute.xlu1 %1619 }
 0x2fd   :  { %1786 = vst [vmem:[#allocation3 + $0x140] sm:$0xff] %v1722_v22  ;;  %1787 = vst [vmem:[#allocation3 + $0x148] sm:$0xff] %v1723_v32  ;;  %v1720_v62 = vadd.f32 %v1620_v37, %v3296_v49  ;;  %v1721_v18 = vadd.f32 %v1620_v37, %v3299_v53 }
 0x2ff   :  { %1784 = vst [vmem:[#allocation3 + $0x130] sm:$0xff] %v1720_v62  ;;  %1785 = vst [vmem:[#allocation3 + $0x138] sm:$0xff] %v1721_v18 }
 0x306   :  { %v1555_v58 = vpop.permute.xlu0 %1554 }
 0x307   :  { %v1694_v46 = vadd.f32 %v1555_v58, %v3341_v23  ;;  %v1695_v55 = vadd.f32 %v1555_v58, %v3344_v9  ;;  %v3753_v58 = vld [vmem:[#allocation18_spill] sm:$0xff] }
 0x308   :  { %v1550_v17 = vpop.permute.xlu1 %1549 }
 0x309   :  { %1758 = vst [vmem:[#allocation3 + $0x60] sm:$0xff] %v1694_v46  ;;  %1759 = vst [vmem:[#allocation3 + $0x68] sm:$0xff] %v1695_v55  ;;  %v1692_v61 = vadd.f32 %v1550_v17, %v3307_v19  ;;  %v1693_v26 = vadd.f32 %v1550_v17, %v3310_v7  ;;  %v3754_v55 = vld [vmem:[#allocation20_spill] sm:$0xff] }
 0x30a   :  { %v1635_v63 = vpop.permute.xlu0 %1634 }
 0x30b   :  { %v1726_v11 = vadd.f32 %v1635_v63, %v3353_v5  ;;  %v1727_v49 = vadd.f32 %v1635_v63, %v3356_v31  ;;  %1756 = vst [vmem:[#allocation3 + $0x50] sm:$0xff] %v1692_v61  ;;  %1757 = vst [vmem:[#allocation3 + $0x58] sm:$0xff] %v1693_v26 }
 0x30c   :  { %v1630_v53 = vpop.permute.xlu1 %1629 }
 0x30d   :  { %1790 = vst [vmem:[#allocation3 + $0x160] sm:$0xff] %v1726_v11  ;;  %1791 = vst [vmem:[#allocation3 + $0x168] sm:$0xff] %v1727_v49  ;;  %v1724_v23 = vadd.f32 %v1630_v53, %v3319_v24  ;;  %v1725_v9 = vadd.f32 %v1630_v53, %v3322_v56 }
 0x30f   :  { %1788 = vst [vmem:[#allocation3 + $0x150] sm:$0xff] %v1724_v23  ;;  %1789 = vst [vmem:[#allocation3 + $0x158] sm:$0xff] %v1725_v9  ;;  %v3757_v23 = vld [vmem:[#allocation19_spill] sm:$0xff] }
 0x316   :  { %v1565_v38 = vpop.permute.xlu0 %1564 }
 0x317   :  { %v1698_v19 = vadd.f32 %v1565_v38, %v3369_v54  ;;  %v1699_v7 = vadd.f32 %v1565_v38, %v3372_v2  ;;  %v3758_v38 = vld [vmem:[#allocation21_spill] sm:$0xff] }
 0x318   :  { %v1560_v5 = vpop.permute.xlu1 %1559 }
 0x319   :  { %1762 = vst [vmem:[#allocation3 + $0x80] sm:$0xff] %v1698_v19  ;;  %1763 = vst [vmem:[#allocation3 + $0x88] sm:$0xff] %v1699_v7  ;;  %v1696_v30 = vadd.f32 %v1560_v5, %v3335_v1  ;;  %v1697_v13 = vadd.f32 %v1560_v5, %v3338_v52  ;;  %v3760_v5 = vld [vmem:[#allocation17_spill] sm:$0xff] }
 0x31a   :  { %v1645_v31 = vpop.permute.xlu0 %1644 }
 0x31b   :  { %v1730_v35 = vadd.f32 %v1645_v31, %v3381_v6  ;;  %v1731_v24 = vadd.f32 %v1645_v31, %v3384_v29  ;;  %1760 = vst [vmem:[#allocation3 + $0x70] sm:$0xff] %v1696_v30  ;;  %1761 = vst [vmem:[#allocation3 + $0x78] sm:$0xff] %v1697_v13 }
 0x31c   :  { %v1640_v56 = vpop.permute.xlu1 %1639 }
 0x31d   :  { %1794 = vst [vmem:[#allocation3 + $0x180] sm:$0xff] %v1730_v35  ;;  %1795 = vst [vmem:[#allocation3 + $0x188] sm:$0xff] %v1731_v24  ;;  %v1728_v54 = vadd.f32 %v1640_v56, %v3347_v8  ;;  %v1729_v2 = vadd.f32 %v1640_v56, %v3350_v57  ;;  %v3746_v8 = vld [vmem:[#allocation54_spill] sm:$0xff] }
 0x31f   :  { %1792 = vst [vmem:[#allocation3 + $0x170] sm:$0xff] %v1728_v54  ;;  %1793 = vst [vmem:[#allocation3 + $0x178] sm:$0xff] %v1729_v2 }
 0x326   :  { %v1575_v44 = vpop.permute.xlu0 %1574 }
 0x327   :  { %v1702_v1 = vadd.f32 %v1575_v44, %v3397_v36  ;;  %v1703_v52 = vadd.f32 %v1575_v44, %v3400_v15  ;;  %v3747_v36 = vld [vmem:[#allocation8_spill] sm:$0xff]  ;;  %v3748_v15 = vld [vmem:[#allocation10_spill] sm:$0xff] }
 0x328   :  { %v1570_v6 = vpop.permute.xlu1 %1569 }
 0x329   :  { %1766 = vst [vmem:[#allocation3 + $0xa0] sm:$0xff] %v1702_v1  ;;  %1767 = vst [vmem:[#allocation3 + $0xa8] sm:$0xff] %v1703_v52  ;;  %v1700_v0 = vadd.f32 %v1570_v6, %v3363_v4  ;;  %v1701_v48 = vadd.f32 %v1570_v6, %v3366_v34 }
 0x32a   :  { %v1655_v29 = vpop.permute.xlu0 %1654 }
 0x32b   :  { %v1734_v47 = vadd.f32 %v1655_v29, %v3409_v50  ;;  %v1735_v45 = vadd.f32 %v1655_v29, %v3746_v8  ;;  %1764 = vst [vmem:[#allocation3 + $0x90] sm:$0xff] %v1700_v0  ;;  %1765 = vst [vmem:[#allocation3 + $0x98] sm:$0xff] %v1701_v48 }
 0x32c   :  { %v1650_v57 = vpop.permute.xlu1 %1649 }
 0x32d   :  { %1798 = vst [vmem:[#allocation3 + $0x1a0] sm:$0xff] %v1734_v47  ;;  %1799 = vst [vmem:[#allocation3 + $0x1a8] sm:$0xff] %v1735_v45  ;;  %v1732_v10 = vadd.f32 %v1650_v57, %v3747_v36  ;;  %v1733_v27 = vadd.f32 %v1650_v57, %v3748_v15 }
 0x32f   :  { %1796 = vst [vmem:[#allocation3 + $0x190] sm:$0xff] %v1732_v10  ;;  %1797 = vst [vmem:[#allocation3 + $0x198] sm:$0xff] %v1733_v27 }
 0x336   :  { %v1585_v25 = vpop.permute.xlu0 %1584 }
 0x337   :  { %v1706_v4 = vadd.f32 %v1585_v25, %v3425_v21  ;;  %v1707_v34 = vadd.f32 %v1585_v25, %v3428_v12  ;;  %v3751_v21 = vld [vmem:[#allocation9_spill] sm:$0xff]  ;;  %v3752_v12 = vld [vmem:[#allocation11_spill] sm:$0xff] }
 0x338   :  { %v1580_v50 = vpop.permute.xlu1 %1579 }
 0x339   :  { %1770 = vst [vmem:[#allocation3 + $0xc0] sm:$0xff] %v1706_v4  ;;  %1771 = vst [vmem:[#allocation3 + $0xc8] sm:$0xff] %v1707_v34  ;;  %v1704_v16 = vadd.f32 %v1580_v50, %v3749_v20  ;;  %v1705_v14 = vadd.f32 %v1580_v50, %v3750_v39 }
 0x33a   :  { %v1665_v40 = vpop.permute.xlu0 %1664 }
 0x33b   :  { %v1738_v28 = vadd.f32 %v1665_v40, %v3437_v3  ;;  %v1739_v60 = vadd.f32 %v1665_v40, %v3440_v43  ;;  %1768 = vst [vmem:[#allocation3 + $0xb0] sm:$0xff] %v1704_v16  ;;  %1769 = vst [vmem:[#allocation3 + $0xb8] sm:$0xff] %v1705_v14 }
 0x33c   :  { %v1660_v42 = vpop.permute.xlu1 %1659 }
 0x33d   :  { %1802 = vst [vmem:[#allocation3 + $0x1c0] sm:$0xff] %v1738_v28  ;;  %1803 = vst [vmem:[#allocation3 + $0x1c8] sm:$0xff] %v1739_v60  ;;  %v1736_v22 = vadd.f32 %v1660_v42, %v3751_v21  ;;  %v1737_v32 = vadd.f32 %v1660_v42, %v3752_v12 }
 0x33f   :  { %1800 = vst [vmem:[#allocation3 + $0x1b0] sm:$0xff] %v1736_v22  ;;  %1801 = vst [vmem:[#allocation3 + $0x1b8] sm:$0xff] %v1737_v32 }
 0x346   :  { %v1595_v37 = vpop.permute.xlu0 %1594 }
 0x347   :  { %v1710_v62 = vadd.f32 %v1595_v37, %v3453_v59  ;;  %v1711_v18 = vadd.f32 %v1595_v37, %v3456_v41  ;;  %v3755_v59 = vld [vmem:[#allocation14_spill] sm:$0xff]  ;;  %v3756_v41 = vld [vmem:[#allocation16_spill] sm:$0xff] }
 0x348   :  { %v1590_v3 = vpop.permute.xlu1 %1589 }
 0x349   :  { %1774 = vst [vmem:[#allocation3 + $0xe0] sm:$0xff] %v1710_v62  ;;  %1775 = vst [vmem:[#allocation3 + $0xe8] sm:$0xff] %v1711_v18  ;;  %v1708_v46 = vadd.f32 %v1590_v3, %v3753_v58  ;;  %v1709_v17 = vadd.f32 %v1590_v3, %v3754_v55 }
 0x34a   :  { %v1675_v43 = vpop.permute.xlu0 %1674 }
 0x34b   :  { %v1742_v63 = vadd.f32 %v1675_v43, %v3465_v51  ;;  %v1743_v61 = vadd.f32 %v1675_v43, %v3468_v33  ;;  %1772 = vst [vmem:[#allocation3 + $0xd0] sm:$0xff] %v1708_v46  ;;  %1773 = vst [vmem:[#allocation3 + $0xd8] sm:$0xff] %v1709_v17  ;;  %v3759_v33 = vld [vmem:[#allocation15_spill] sm:$0xff] }
 0x34c   :  { %v1670_v26 = vpop.permute.xlu1 %1669 }
 0x34d   :  { %1806 = vst [vmem:[#allocation3 + $0x1e0] sm:$0xff] %v1742_v63  ;;  %1807 = vst [vmem:[#allocation3 + $0x1e8] sm:$0xff] %v1743_v61  ;;  %v1740_v11 = vadd.f32 %v1670_v26, %v3755_v59  ;;  %v1741_v49 = vadd.f32 %v1670_v26, %v3756_v41 }
 0x34f   :  { %1804 = vst [vmem:[#allocation3 + $0x1d0] sm:$0xff] %v1740_v11  ;;  %1805 = vst [vmem:[#allocation3 + $0x1d8] sm:$0xff] %v1741_v49 }
 0x358   :  { %v1600_v53 = vpop.permute.xlu1 %1599 }
 0x359   :  { %v1712_v9 = vadd.f32 %v1600_v53, %v3757_v23  ;;  %v1713_v19 = vadd.f32 %v1600_v53, %v3758_v38 }
 0x35b   :  { %1776 = vst [vmem:[#allocation3 + $0xf0] sm:$0xff] %v1712_v9  ;;  %1777 = vst [vmem:[#allocation3 + $0xf8] sm:$0xff] %v1713_v19 }
 0x35c   :  { %v1680_v51 = vpop.permute.xlu1 %1679 }
 0x35d   :  { %v1744_v7 = vadd.f32 %v1680_v51, %v3759_v33  ;;  %v1745_v31 = vadd.f32 %v1680_v51, %v3760_v5 }
 0x35f   :  { %1808 = vst [vmem:[#allocation3 + $0x1f0] sm:$0xff] %v1744_v7  ;;  %1809 = vst [vmem:[#allocation3 + $0x1f8] sm:$0xff] %v1745_v31 }
 0x360   :  { %1943 = shalt.err (!%p1940_p4)
}
 0x361   :  { %s1944_s4 = scalar_lea.hbm %s3553_s3, 8192 }
 0x362   :  { %p1945_p5 = scmp.ne.s32.totalorder %s3553_s3, %s1944_s4  ;;  %p1948_p6 = scmp.lt.u32.totalorder %s1944_s4, %s3553_s3 }
 0x364   :  { %p1950_p7 = pnand %p1948_p6, %p1945_p5 }
 0x366   :  { %1953 = shalt.err (!%p1950_p7)
}
 0x367   :  { %s1960_s9 = smov 256   ;;  %s1961_s0 = smov 16  }
 0x368   :  { %1821 = dma.vmem_to_hbm [thread:$0]  %s1816_s23, 8192, %s3553_s3, [#allocation4], %s1960_s9, %s1960_s9, %s1961_s0  }
 0x369   :  { %1954 = dma.done.wait [#allocation4], 8192  }
 0x36a   :  { %1955 = vsyncadd [#allocation4], 4294959104 }
 0x36b   :  { %1825 = vsyncpa [#allocation4], 1 }

</bundles_post_ra>
